<compile_context>
chip_gen: v7x
topology: tpu7x:2x2x1
jax: 0.10.0
libtpu: 0.0.40
codegen_flags: <defaults>
</compile_context>

<pallas_src>
import math
import jax
import jax.numpy as jnp
from jax.experimental import pallas as pl
from jax.experimental.pallas import tpu as pltpu

# ---- small synthetic dims (stand-ins for ModernBERT's 768-hidden config) ----
B, S, H = 2, 8, 32          # batch, seq, hidden
NH, DH = 2, 16              # heads, head dim
FFN = 64                    # feed-forward width
VOCAB = 50
KDIM = 16                   # knowledge_dim (module default 64, scaled down)
NLAYERS = 2
NCLASS = 2


# ----------------------------- kernel helpers -------------------------------
def _gelu(x):
    c = math.sqrt(2.0 / math.pi)
    return 0.5 * x * (1.0 + jnp.tanh(c * (x + 0.044715 * x * x * x)))


def _layernorm(x, g, b, eps=1e-5):
    mu = jnp.mean(x, axis=-1, keepdims=True)
    var = jnp.mean((x - mu) ** 2, axis=-1, keepdims=True)
    return (x - mu) * jax.lax.rsqrt(var + eps) * g + b


# --------------------- fused encoder-stack + head kernel ---------------------
# grid = (NLAYERS,): one encoder layer per grid step.  The activation lives in
# a VMEM scratch (act_ref) for the entire stack; per-layer weights are the
# only pipelined (streamed) inputs.  The classifier head + CE loss run in the
# last grid step on the in-VMEM activation ([CLS] rows), so the only HBM
# outputs of the whole forward are logits (B, NCLASS) and the scalar loss.
def fused_kernel(x_ref, mask_ref,
                 wqkv_ref, wo_ref, w1_ref, w2_ref, aux_ref,
                 know_ref, onehot_ref, wkp_ref, bkp_ref, wct_ref, wcb_ref,
                 bc_ref,
                 logits_ref, loss_ref,
                 act_ref):
    l = pl.program_id(0)

    @pl.when(l == 0)
    def _():
        act_ref[...] = x_ref[...]                 # seed resident activation

    x = act_ref[...]                              # (B*S, H) f32, VMEM-resident
    mask_add = (mask_ref[...] - 1.0) * 1e9        # (B, 1, S) f32, broadcast later

    # this layer's weights / packed bias+LN slab (streamed per grid step)
    wqkv = wqkv_ref[...]                          # (H, 3H)  bf16
    wo = wo_ref[...]                              # (H, H)   bf16
    w1 = w1_ref[...]                              # (H, FFN) bf16
    w2 = w2_ref[...]                              # (FFN, H) bf16
    aux = aux_ref[...]                            # (8, 3H)  f32
    bqkv = aux[0:1, :]                            # (1, 3H)
    b1 = aux[1:2, :FFN]                           # (1, FFN)
    bo = aux[2:3, :H]
    ln1g = aux[3:4, :H]
    ln1b = aux[4:5, :H]
    b2 = aux[5:6, :H]
    ln2g = aux[6:7, :H]
    ln2b = aux[7:8, :H]

    # ---- fused QKV projection, then keep attention intermediates in bf16 ----
    xb = x.astype(jnp.bfloat16)
    qkv = (jnp.dot(xb, wqkv, preferred_element_type=jnp.float32) + bqkv
           ).astype(jnp.bfloat16)                 # (B*S, 3H) bf16

    # ---- per-head attention: lane slices + free leading-dim reshapes only ---
    scale = 1.0 / math.sqrt(DH)
    ctx_heads = []
    for h in range(NH):                           # unrolled; NH is small
        q_h = qkv[:, h * DH:(h + 1) * DH].reshape(B, S, DH)
        k_h = qkv[:, H + h * DH:H + (h + 1) * DH].reshape(B, S, DH)
        v_h = qkv[:, 2 * H + h * DH:2 * H + (h + 1) * DH].reshape(B, S, DH)
        s_h = jnp.einsum('bqd,bkd->bqk', q_h, k_h,
                         preferred_element_type=jnp.float32) * scale
        s_h = s_h + mask_add                      # broadcast (B,1,S) over q
        m_h = jnp.max(s_h, axis=-1, keepdims=True)
        p_h = jnp.exp(s_h - m_h)
        den = jnp.sum(p_h, axis=-1, keepdims=True)
        p_h = p_h * pl.reciprocal(den, approx=True)          # EUP, not VALU
        ctx_h = jnp.einsum('bqk,bkd->bqd', p_h.astype(jnp.bfloat16), v_h,
                           preferred_element_type=jnp.float32)  # (B, S, DH)
        ctx_heads.append(ctx_h.astype(jnp.bfloat16).reshape(B * S, DH))

    # ---- one lane-dense reassembly, then a single dense Wo matmul ----------
    ctx = jnp.concatenate(ctx_heads, axis=-1)     # (B*S, H) bf16
    attn = jnp.dot(ctx, wo, preferred_element_type=jnp.float32) + bo

    h1 = _layernorm(x + attn, ln1g, ln1b)         # f32 residual / LN stats

    # ---- feed-forward --------------------------------------------------------
    f = _gelu(jnp.dot(h1.astype(jnp.bfloat16), w1,
                      preferred_element_type=jnp.float32) + b1)
    f2 = jnp.dot(f.astype(jnp.bfloat16), w2,
                 preferred_element_type=jnp.float32) + b2
    new_act = _layernorm(h1 + f2, ln2g, ln2b)
    act_ref[...] = new_act

    # ---- fused head on the final layer: pool [CLS], project, classify, CE ---
    @pl.when(l == NLAYERS - 1)
    def _():
        pooled = new_act.reshape(B, S, H)[:, 0, :]                 # (B, H)
        kvec = (jnp.dot(know_ref[...].astype(jnp.bfloat16), wkp_ref[...],
                        preferred_element_type=jnp.float32)
                + bkp_ref[...])                                    # (B, KDIM)
        # [pooled, kvec] @ wc == pooled @ wc[:H] + kvec @ wc[H:]  (no concat)
        logits = (jnp.dot(pooled.astype(jnp.bfloat16), wct_ref[...],
                          preferred_element_type=jnp.float32)
                  + jnp.dot(kvec.astype(jnp.bfloat16), wcb_ref[...],
                            preferred_element_type=jnp.float32)
                  + bc_ref[...])                                   # (B, NCLASS)
        logits_ref[...] = logits

        # CrossEntropyLoss (mean over batch) via one-hot labels, f32 stats.
        m = jnp.max(logits, axis=-1, keepdims=True)
        z = logits - m
        lse = jnp.log(jnp.sum(jnp.exp(z), axis=-1, keepdims=True))
        nll = -jnp.sum(onehot_ref[...] * (z - lse), axis=-1, keepdims=True)
        loss_ref[...] = jnp.sum(nll, axis=0, keepdims=True) * (1.0 / B)


def knowledge_enhanced_bert_fused(x2d, mask3, enc_params, know, onehot,
                                  wkp, bkp, wct, wcb, bc):
    wqkv, wo, w1, w2, aux = enc_params
    vmem = pltpu.MemorySpace.VMEM
    resident = pl.BlockSpec(memory_space=vmem)     # whole array, single copy
    grid_spec = pltpu.PrefetchScalarGridSpec(
        num_scalar_prefetch=0,
        grid=(NLAYERS,),
        in_specs=[
            resident,                                              # x seed
            resident,                                              # mask
            pl.BlockSpec((None, H, 3 * H), lambda l: (l, 0, 0)),   # wqkv[l]
            pl.BlockSpec((None, H, H), lambda l: (l, 0, 0)),       # wo[l]
            pl.BlockSpec((None, H, FFN), lambda l: (l, 0, 0)),     # w1[l]
            pl.BlockSpec((None, FFN, H), lambda l: (l, 0, 0)),     # w2[l]
            pl.BlockSpec((None, 8, 3 * H), lambda l: (l, 0, 0)),   # aux[l]
            resident,                                              # know
            resident,                                              # onehot
            resident,                                              # wkp
            resident,                                              # bkp
            resident,                                              # wct
            resident,                                              # wcb
            resident,                                              # bc
        ],
        out_specs=(
            pl.BlockSpec((B, NCLASS), lambda l: (0, 0)),           # logits
            pl.BlockSpec((1, 1), lambda l: (0, 0)),                # loss
        ),
        scratch_shapes=[pltpu.VMEM((B * S, H), jnp.float32)],      # activation
    )
    return pl.pallas_call(
        fused_kernel,
        out_shape=(jax.ShapeDtypeStruct((B, NCLASS), jnp.float32),
                   jax.ShapeDtypeStruct((1, 1), jnp.float32)),
        grid_spec=grid_spec,
        compiler_params=pltpu.CompilerParams(
            dimension_semantics=("arbitrary",),      # layers are sequential
            vmem_limit_bytes=32 * 1024 * 1024),
    )(x2d, mask3, wqkv, wo, w1, w2, aux,
      know, onehot, wkp, bkp, wct, wcb, bc)


# --------------------------- parameter construction --------------------------
def xavier_normal(key, shape):
    std = math.sqrt(2.0 / (shape[0] + shape[1]))
    return std * jax.random.normal(key, shape, jnp.float32)


def make_params(key):
    # aux-row packing below assumes the FFN bias fits inside a 3H-wide row.
    assert FFN <= 3 * H
    ks = jax.random.split(key, 8)
    nrm = lambda k, shp: 0.02 * jax.random.normal(k, shp, jnp.float32)

    # ---- stand-in encoder stack: stacked per-layer weights (bf16 for MXU) ----
    kw = jax.random.split(ks[0], 4)
    wqkv = nrm(kw[0], (NLAYERS, H, 3 * H)).astype(jnp.bfloat16)   # fused QKV
    wo = nrm(kw[1], (NLAYERS, H, H)).astype(jnp.bfloat16)         # dense Wo
    w1 = nrm(kw[2], (NLAYERS, H, FFN)).astype(jnp.bfloat16)
    w2 = nrm(kw[3], (NLAYERS, FFN, H)).astype(jnp.bfloat16)

    # packed bias/LN slab (NLAYERS, 8, 3H), f32, rows:
    #   0: bqkv  1: b1  2: bo  3: ln1_g  4: ln1_b  5: b2  6: ln2_g  7: ln2_b
    def row(v):
        return jnp.pad(v, ((0, 0), (0, 3 * H - v.shape[1])))
    zH = jnp.zeros((NLAYERS, H), jnp.float32)
    oH = jnp.ones((NLAYERS, H), jnp.float32)
    aux = jnp.stack([
        jnp.zeros((NLAYERS, 3 * H), jnp.float32),
        row(jnp.zeros((NLAYERS, FFN), jnp.float32)),
        row(zH), row(oH), row(zH), row(zH), row(oH), row(zH),
    ], axis=1)

    # final_classifier: Linear(H + KDIM, 2), xavier W, zero b — split for the
    # concat-free head matmul.  Weights stored bf16 (f32 accumulation in-kernel).
    wc = xavier_normal(ks[3], (H + KDIM, NCLASS))

    return {
        "token_emb": nrm(ks[1], (VOCAB, H)),
        "pos_emb": nrm(ks[2], (S, H)),
        "enc": (wqkv, wo, w1, w2, aux),
        # knowledge_projection: Linear(3*KDIM, KDIM), xavier W, zero b
        "wkp": xavier_normal(ks[4], (3 * KDIM, KDIM)).astype(jnp.bfloat16),
        "bkp": jnp.zeros((1, KDIM), jnp.float32),
        "wc_top": wc[:H].astype(jnp.bfloat16),
        "wc_bot": wc[H:].astype(jnp.bfloat16),
        "bc": jnp.zeros((1, NCLASS), jnp.float32),
    }


# --------------------------------- forward ----------------------------------
def knowledge_enhanced_bert_forward(params, input_ids, attention_mask,
                                    knowledge_features, labels=None):
    # embedding lookup + learned positions (glue outside the kernel)
    x = jnp.take(params["token_emb"], input_ids, axis=0) + params["pos_emb"][None]
    x2d = x.reshape(B * S, H)
    mask3 = attention_mask.astype(jnp.float32).reshape(B, 1, S)
    onehot = (jax.nn.one_hot(labels, NCLASS, dtype=jnp.float32)
              if labels is not None else jnp.zeros((B, NCLASS), jnp.float32))

    logits, loss = knowledge_enhanced_bert_fused(
        x2d, mask3, params["enc"], knowledge_features, onehot,
        params["wkp"], params["bkp"], params["wc_top"], params["wc_bot"],
        params["bc"])

    if labels is not None:
        return {"loss": loss[0, 0], "logits": logits}
    return logits


# ----------------------------------- main ------------------------------------
if __name__ == "__main__":
    root = jax.random.PRNGKey(0)
    k_param, k_ids, k_know = jax.random.split(root, 3)

    params = make_params(k_param)

    input_ids = jax.random.randint(k_ids, (B, S), 0, VOCAB, dtype=jnp.int32)
    attention_mask = jnp.array([[1, 1, 1, 1, 1, 1, 1, 1],
                                [1, 1, 1, 1, 1, 1, 0, 0]], dtype=jnp.int32)
    knowledge_features = jax.random.normal(k_know, (B, 3 * KDIM), jnp.float32)
    labels = jnp.array([0, 1], dtype=jnp.int32)

    out = knowledge_enhanced_bert_forward(params, input_ids, attention_mask,
                                          knowledge_features, labels=labels)
    out = jax.block_until_ready(out)

    assert out["logits"].shape == (B, NCLASS)
    assert out["loss"].shape == ()
    assert bool(jnp.isfinite(out["loss"]))
    print("KERNEL_OK")
</pallas_src>

<mosaic_0001>
module attributes {stable_mosaic.version = 11 : i64} {
  func.func @fused_kernel(%arg0: i32, %arg1: memref<16x32xf32, #tpu.memory_space<vmem>>, %arg2: memref<2x1x8xf32, #tpu.memory_space<vmem>>, %arg3: memref<1x32x96xbf16, #tpu.memory_space<vmem>>, %arg4: memref<1x32x32xbf16, #tpu.memory_space<vmem>>, %arg5: memref<1x32x64xbf16, #tpu.memory_space<vmem>>, %arg6: memref<1x64x32xbf16, #tpu.memory_space<vmem>>, %arg7: memref<1x8x96xf32, #tpu.memory_space<vmem>>, %arg8: memref<2x48xf32, #tpu.memory_space<vmem>>, %arg9: memref<2x2xf32, #tpu.memory_space<vmem>>, %arg10: memref<48x16xbf16, #tpu.memory_space<vmem>>, %arg11: memref<1x16xf32, #tpu.memory_space<vmem>>, %arg12: memref<32x2xbf16, #tpu.memory_space<vmem>>, %arg13: memref<16x2xbf16, #tpu.memory_space<vmem>>, %arg14: memref<1x2xf32, #tpu.memory_space<vmem>>, %arg15: memref<2x2xf32, #tpu.memory_space<vmem>>, %arg16: memref<1x1xf32, #tpu.memory_space<vmem>>, %arg17: memref<16x32xf32, #tpu.memory_space<vmem>>) attributes {dimension_semantics = [#tpu.dimension_semantics<arbitrary>], iteration_bounds = array<i64: 2>, scalar_prefetch = 0 : i64, scratch_operands = 1 : i64, tpu.core_type = #tpu.core_type<tc>, window_params = [{pipeline_mode = #tpu.pipeline_mode<synchronous>, transform_indices = @transform_0, window_bounds = array<i64: 16, 32>}, {pipeline_mode = #tpu.pipeline_mode<synchronous>, transform_indices = @transform_1, window_bounds = array<i64: 2, 1, 8>}, {transform_indices = @transform_2, window_bounds = array<i64: 1, 32, 96>}, {transform_indices = @transform_3, window_bounds = array<i64: 1, 32, 32>}, {transform_indices = @transform_4, window_bounds = array<i64: 1, 32, 64>}, {transform_indices = @transform_5, window_bounds = array<i64: 1, 64, 32>}, {transform_indices = @transform_6, window_bounds = array<i64: 1, 8, 96>}, {pipeline_mode = #tpu.pipeline_mode<synchronous>, transform_indices = @transform_7, window_bounds = array<i64: 2, 48>}, {pipeline_mode = #tpu.pipeline_mode<synchronous>, transform_indices = @transform_8, window_bounds = array<i64: 2, 2>}, {pipeline_mode = #tpu.pipeline_mode<synchronous>, transform_indices = @transform_9, window_bounds = array<i64: 48, 16>}, {pipeline_mode = #tpu.pipeline_mode<synchronous>, transform_indices = @transform_10, window_bounds = array<i64: 1, 16>}, {pipeline_mode = #tpu.pipeline_mode<synchronous>, transform_indices = @transform_11, window_bounds = array<i64: 32, 2>}, {pipeline_mode = #tpu.pipeline_mode<synchronous>, transform_indices = @transform_12, window_bounds = array<i64: 16, 2>}, {pipeline_mode = #tpu.pipeline_mode<synchronous>, transform_indices = @transform_13, window_bounds = array<i64: 1, 2>}, {pipeline_mode = #tpu.pipeline_mode<synchronous>, transform_indices = @transform_14, window_bounds = array<i64: 2, 2>}, {pipeline_mode = #tpu.pipeline_mode<synchronous>, transform_indices = @transform_15, window_bounds = array<i64: 1, 1>}]} {
    %c0_i32 = arith.constant 0 : i32
    %0 = arith.cmpi eq, %arg0, %c0_i32 : i32
    %1 = arith.extui %0 : i1 to i32
    %c0_i32_0 = arith.constant 0 : i32
    %2 = arith.cmpi ne, %1, %c0_i32_0 : i32
    scf.if %2 {
      %c0_52 = arith.constant 0 : index
      %c0_53 = arith.constant 0 : index
      %157 = vector.load %arg1[%c0_52, %c0_53] : memref<16x32xf32, #tpu.memory_space<vmem>>, vector<16x32xf32>
      %c0_54 = arith.constant 0 : index
      %c0_55 = arith.constant 0 : index
      %158 = vector.load %arg17[%c0_54, %c0_55] : memref<16x32xf32, #tpu.memory_space<vmem>>, vector<16x32xf32>
      tpu.vector_store %arg17[%c0_54, %c0_55], %157 {strides = array<i32>} : memref<16x32xf32, #tpu.memory_space<vmem>>, vector<16x32xf32>,
    } else {
    }
    %c0 = arith.constant 0 : index
    %c0_1 = arith.constant 0 : index
    %3 = vector.load %arg17[%c0, %c0_1] : memref<16x32xf32, #tpu.memory_space<vmem>>, vector<16x32xf32>
    %c0_2 = arith.constant 0 : index
    %c0_3 = arith.constant 0 : index
    %c0_4 = arith.constant 0 : index
    %4 = vector.load %arg2[%c0_2, %c0_3, %c0_4] : memref<2x1x8xf32, #tpu.memory_space<vmem>>, vector<2x1x8xf32>
    %cst = arith.constant 1.000000e+00 : f32
    %5 = vector.broadcast %cst : f32 to vector<2x1x8xf32>
    %6 = arith.subf %4, %5 : vector<2x1x8xf32>
    %cst_5 = arith.constant 1.000000e+09 : f32
    %7 = vector.broadcast %cst_5 : f32 to vector<2x1x8xf32>
    %8 = arith.mulf %6, %7 : vector<2x1x8xf32>
    %c0_6 = arith.constant 0 : index
    %c0_7 = arith.constant 0 : index
    %c0_8 = arith.constant 0 : index
    %9 = vector.load %arg3[%c0_6, %c0_7, %c0_8] : memref<1x32x96xbf16, #tpu.memory_space<vmem>>, vector<1x32x96xbf16>
    %10 = vector.shape_cast %9 : vector<1x32x96xbf16> to vector<32x96xbf16>
    %c0_9 = arith.constant 0 : index
    %c0_10 = arith.constant 0 : index
    %c0_11 = arith.constant 0 : index
    %11 = vector.load %arg4[%c0_9, %c0_10, %c0_11] : memref<1x32x32xbf16, #tpu.memory_space<vmem>>, vector<1x32x32xbf16>
    %12 = vector.shape_cast %11 : vector<1x32x32xbf16> to vector<32x32xbf16>
    %c0_12 = arith.constant 0 : index
    %c0_13 = arith.constant 0 : index
    %c0_14 = arith.constant 0 : index
    %13 = vector.load %arg5[%c0_12, %c0_13, %c0_14] : memref<1x32x64xbf16, #tpu.memory_space<vmem>>, vector<1x32x64xbf16>
    %14 = vector.shape_cast %13 : vector<1x32x64xbf16> to vector<32x64xbf16>
    %c0_15 = arith.constant 0 : index
    %c0_16 = arith.constant 0 : index
    %c0_17 = arith.constant 0 : index
    %15 = vector.load %arg6[%c0_15, %c0_16, %c0_17] : memref<1x64x32xbf16, #tpu.memory_space<vmem>>, vector<1x64x32xbf16>
    %16 = vector.shape_cast %15 : vector<1x64x32xbf16> to vector<64x32xbf16>
    %c0_18 = arith.constant 0 : index
    %c0_19 = arith.constant 0 : index
    %c0_20 = arith.constant 0 : index
    %17 = vector.load %arg7[%c0_18, %c0_19, %c0_20] : memref<1x8x96xf32, #tpu.memory_space<vmem>>, vector<1x8x96xf32>
    %18 = vector.shape_cast %17 : vector<1x8x96xf32> to vector<8x96xf32>
    %19 = vector.extract_strided_slice %18 {offsets = [0, 0], sizes = [1, 96], strides = [1, 1]} : vector<8x96xf32> to vector<1x96xf32>
    %20 = vector.extract_strided_slice %18 {offsets = [1, 0], sizes = [1, 64], strides = [1, 1]} : vector<8x96xf32> to vector<1x64xf32>
    %21 = vector.extract_strided_slice %18 {offsets = [2, 0], sizes = [1, 32], strides = [1, 1]} : vector<8x96xf32> to vector<1x32xf32>
    %22 = vector.extract_strided_slice %18 {offsets = [3, 0], sizes = [1, 32], strides = [1, 1]} : vector<8x96xf32> to vector<1x32xf32>
    %23 = vector.extract_strided_slice %18 {offsets = [4, 0], sizes = [1, 32], strides = [1, 1]} : vector<8x96xf32> to vector<1x32xf32>
    %24 = vector.extract_strided_slice %18 {offsets = [5, 0], sizes = [1, 32], strides = [1, 1]} : vector<8x96xf32> to vector<1x32xf32>
    %25 = vector.extract_strided_slice %18 {offsets = [6, 0], sizes = [1, 32], strides = [1, 1]} : vector<8x96xf32> to vector<1x32xf32>
    %26 = vector.extract_strided_slice %18 {offsets = [7, 0], sizes = [1, 32], strides = [1, 1]} : vector<8x96xf32> to vector<1x32xf32>
    %27 = arith.truncf %3 : vector<16x32xf32> to vector<16x32xbf16>
    %cst_21 = arith.constant dense<0.000000e+00> : vector<16x96xf32>
    %28 = tpu.matmul %27, %10, %cst_21 {dimension_numbers = #tpu.dot_dimension_numbers<[1], [0], [0], [1], [0, 0, 1, 1], [], []>} : vector<16x32xbf16>, vector<32x96xbf16>, vector<16x96xf32> -> vector<16x96xf32>
    %29 = vector.broadcast %19 : vector<1x96xf32> to vector<16x96xf32>
    %30 = arith.addf %28, %29 : vector<16x96xf32>
    %31 = arith.truncf %30 : vector<16x96xf32> to vector<16x96xbf16>
    %32 = vector.extract_strided_slice %31 {offsets = [0, 0], sizes = [16, 16], strides = [1, 1]} : vector<16x96xbf16> to vector<16x16xbf16>
    %33 = vector.shape_cast %32 : vector<16x16xbf16> to vector<2x8x16xbf16>
    %34 = vector.extract_strided_slice %31 {offsets = [0, 32], sizes = [16, 16], strides = [1, 1]} : vector<16x96xbf16> to vector<16x16xbf16>
    %35 = vector.shape_cast %34 : vector<16x16xbf16> to vector<2x8x16xbf16>
    %36 = vector.extract_strided_slice %31 {offsets = [0, 64], sizes = [16, 16], strides = [1, 1]} : vector<16x96xbf16> to vector<16x16xbf16>
    %37 = vector.shape_cast %36 : vector<16x16xbf16> to vector<2x8x16xbf16>
    "tpu.trace_start"() <{level = 10 : i32, message = "bqd,bkd->bqk"}> : () -> ()
    %cst_22 = arith.constant dense<0.000000e+00> : vector<2x8x8xf32>
    %38 = tpu.matmul %33, %35, %cst_22 {dimension_numbers = #tpu.dot_dimension_numbers<[2], [2], [1], [1], [0, 0, 0, 1, 1, 1], [0], [0]>} : vector<2x8x16xbf16>, vector<2x8x16xbf16>, vector<2x8x8xf32> -> vector<2x8x8xf32>
    "tpu.trace_stop"() : () -> ()
    %cst_23 = arith.constant 2.500000e-01 : f32
    %39 = vector.broadcast %cst_23 : f32 to vector<2x8x8xf32>
    %40 = arith.mulf %38, %39 : vector<2x8x8xf32>
    %41 = vector.broadcast %8 : vector<2x1x8xf32> to vector<2x8x8xf32>
    %42 = arith.addf %40, %41 : vector<2x8x8xf32>
    %cst_24 = arith.constant dense<0xFF800000> : vector<2x8xf32>
    %43 = vector.multi_reduction <maximumf>, %42, %cst_24 [2] : vector<2x8x8xf32> to vector<2x8xf32>
    %44 = vector.shape_cast %43 : vector<2x8xf32> to vector<2x8x1xf32>
    %45 = vector.broadcast %44 : vector<2x8x1xf32> to vector<2x8x8xf32>
    %46 = arith.subf %42, %45 : vector<2x8x8xf32>
    %47 = math.exp %46 : vector<2x8x8xf32>
    %cst_25 = arith.constant dense<0.000000e+00> : vector<2x8xf32>
    %48 = vector.multi_reduction <add>, %47, %cst_25 [2] : vector<2x8x8xf32> to vector<2x8xf32>
    %49 = vector.shape_cast %48 : vector<2x8xf32> to vector<2x8x1xf32>
    %50 = tpu.reciprocal %49 {approx = true} : vector<2x8x1xf32> -> vector<2x8x1xf32>
    %51 = vector.broadcast %50 : vector<2x8x1xf32> to vector<2x8x8xf32>
    %52 = arith.mulf %47, %51 : vector<2x8x8xf32>
    %53 = arith.truncf %52 : vector<2x8x8xf32> to vector<2x8x8xbf16>
    "tpu.trace_start"() <{level = 10 : i32, message = "bqk,bkd->bqd"}> : () -> ()
    %cst_26 = arith.constant dense<0.000000e+00> : vector<2x8x16xf32>
    %54 = tpu.matmul %53, %37, %cst_26 {dimension_numbers = #tpu.dot_dimension_numbers<[2], [1], [1], [2], [0, 0, 0, 1, 1, 2], [0], [0]>} : vector<2x8x8xbf16>, vector<2x8x16xbf16>, vector<2x8x16xf32> -> vector<2x8x16xf32>
    "tpu.trace_stop"() : () -> ()
    %55 = arith.truncf %54 : vector<2x8x16xf32> to vector<2x8x16xbf16>
    %56 = vector.shape_cast %55 : vector<2x8x16xbf16> to vector<16x16xbf16>
    %57 = vector.extract_strided_slice %31 {offsets = [0, 16], sizes = [16, 16], strides = [1, 1]} : vector<16x96xbf16> to vector<16x16xbf16>
    %58 = vector.shape_cast %57 : vector<16x16xbf16> to vector<2x8x16xbf16>
    %59 = vector.extract_strided_slice %31 {offsets = [0, 48], sizes = [16, 16], strides = [1, 1]} : vector<16x96xbf16> to vector<16x16xbf16>
    %60 = vector.shape_cast %59 : vector<16x16xbf16> to vector<2x8x16xbf16>
    %61 = vector.extract_strided_slice %31 {offsets = [0, 80], sizes = [16, 16], strides = [1, 1]} : vector<16x96xbf16> to vector<16x16xbf16>
    %62 = vector.shape_cast %61 : vector<16x16xbf16> to vector<2x8x16xbf16>
    "tpu.trace_start"() <{level = 10 : i32, message = "bqd,bkd->bqk"}> : () -> ()
    %cst_27 = arith.constant dense<0.000000e+00> : vector<2x8x8xf32>
    %63 = tpu.matmul %58, %60, %cst_27 {dimension_numbers = #tpu.dot_dimension_numbers<[2], [2], [1], [1], [0, 0, 0, 1, 1, 1], [0], [0]>} : vector<2x8x16xbf16>, vector<2x8x16xbf16>, vector<2x8x8xf32> -> vector<2x8x8xf32>
    "tpu.trace_stop"() : () -> ()
    %cst_28 = arith.constant 2.500000e-01 : f32
    %64 = vector.broadcast %cst_28 : f32 to vector<2x8x8xf32>
    %65 = arith.mulf %63, %64 : vector<2x8x8xf32>
    %66 = vector.broadcast %8 : vector<2x1x8xf32> to vector<2x8x8xf32>
    %67 = arith.addf %65, %66 : vector<2x8x8xf32>
    %cst_29 = arith.constant dense<0xFF800000> : vector<2x8xf32>
    %68 = vector.multi_reduction <maximumf>, %67, %cst_29 [2] : vector<2x8x8xf32> to vector<2x8xf32>
    %69 = vector.shape_cast %68 : vector<2x8xf32> to vector<2x8x1xf32>
    %70 = vector.broadcast %69 : vector<2x8x1xf32> to vector<2x8x8xf32>
    %71 = arith.subf %67, %70 : vector<2x8x8xf32>
    %72 = math.exp %71 : vector<2x8x8xf32>
    %cst_30 = arith.constant dense<0.000000e+00> : vector<2x8xf32>
    %73 = vector.multi_reduction <add>, %72, %cst_30 [2] : vector<2x8x8xf32> to vector<2x8xf32>
    %74 = vector.shape_cast %73 : vector<2x8xf32> to vector<2x8x1xf32>
    %75 = tpu.reciprocal %74 {approx = true} : vector<2x8x1xf32> -> vector<2x8x1xf32>
    %76 = vector.broadcast %75 : vector<2x8x1xf32> to vector<2x8x8xf32>
    %77 = arith.mulf %72, %76 : vector<2x8x8xf32>
    %78 = arith.truncf %77 : vector<2x8x8xf32> to vector<2x8x8xbf16>
    "tpu.trace_start"() <{level = 10 : i32, message = "bqk,bkd->bqd"}> : () -> ()
    %cst_31 = arith.constant dense<0.000000e+00> : vector<2x8x16xf32>
    %79 = tpu.matmul %78, %62, %cst_31 {dimension_numbers = #tpu.dot_dimension_numbers<[2], [1], [1], [2], [0, 0, 0, 1, 1, 2], [0], [0]>} : vector<2x8x8xbf16>, vector<2x8x16xbf16>, vector<2x8x16xf32> -> vector<2x8x16xf32>
    "tpu.trace_stop"() : () -> ()
    %80 = arith.truncf %79 : vector<2x8x16xf32> to vector<2x8x16xbf16>
    %81 = vector.shape_cast %80 : vector<2x8x16xbf16> to vector<16x16xbf16>
    %82 = tpu.concatenate %56, %81 in 1 : vector<16x16xbf16>, vector<16x16xbf16> -> vector<16x32xbf16>
    %cst_32 = arith.constant dense<0.000000e+00> : vector<16x32xf32>
    %83 = tpu.matmul %82, %12, %cst_32 {dimension_numbers = #tpu.dot_dimension_numbers<[1], [0], [0], [1], [0, 0, 1, 1], [], []>} : vector<16x32xbf16>, vector<32x32xbf16>, vector<16x32xf32> -> vector<16x32xf32>
    %84 = vector.broadcast %21 : vector<1x32xf32> to vector<16x32xf32>
    %85 = arith.addf %83, %84 : vector<16x32xf32>
    %86 = arith.addf %3, %85 : vector<16x32xf32>
    %cst_33 = arith.constant dense<0.000000e+00> : vector<16xf32>
    %87 = vector.multi_reduction <add>, %86, %cst_33 [1] : vector<16x32xf32> to vector<16xf32>
    %88 = vector.shape_cast %87 : vector<16xf32> to vector<16x1xf32>
    %cst_34 = arith.constant 3.200000e+01 : f32
    %89 = vector.broadcast %cst_34 : f32 to vector<16x1xf32>
    %90 = arith.divf %88, %89 : vector<16x1xf32>
    %91 = vector.broadcast %90 : vector<16x1xf32> to vector<16x32xf32>
    %92 = arith.subf %86, %91 : vector<16x32xf32>
    %93 = arith.mulf %92, %92 : vector<16x32xf32>
    %cst_35 = arith.constant dense<0.000000e+00> : vector<16xf32>
    %94 = vector.multi_reduction <add>, %93, %cst_35 [1] : vector<16x32xf32> to vector<16xf32>
    %95 = vector.shape_cast %94 : vector<16xf32> to vector<16x1xf32>
    %cst_36 = arith.constant 3.200000e+01 : f32
    %96 = vector.broadcast %cst_36 : f32 to vector<16x1xf32>
    %97 = arith.divf %95, %96 : vector<16x1xf32>
    %98 = vector.broadcast %90 : vector<16x1xf32> to vector<16x32xf32>
    %99 = arith.subf %86, %98 : vector<16x32xf32>
    %cst_37 = arith.constant 9.99999974E-6 : f32
    %100 = vector.broadcast %cst_37 : f32 to vector<16x1xf32>
    %101 = arith.addf %97, %100 : vector<16x1xf32>
    %102 = math.rsqrt %101 : vector<16x1xf32>
    %103 = vector.broadcast %102 : vector<16x1xf32> to vector<16x32xf32>
    %104 = arith.mulf %99, %103 : vector<16x32xf32>
    %105 = vector.broadcast %22 : vector<1x32xf32> to vector<16x32xf32>
    %106 = arith.mulf %104, %105 : vector<16x32xf32>
    %107 = vector.broadcast %23 : vector<1x32xf32> to vector<16x32xf32>
    %108 = arith.addf %106, %107 : vector<16x32xf32>
    %109 = arith.truncf %108 : vector<16x32xf32> to vector<16x32xbf16>
    %cst_38 = arith.constant dense<0.000000e+00> : vector<16x64xf32>
    %110 = tpu.matmul %109, %14, %cst_38 {dimension_numbers = #tpu.dot_dimension_numbers<[1], [0], [0], [1], [0, 0, 1, 1], [], []>} : vector<16x32xbf16>, vector<32x64xbf16>, vector<16x64xf32> -> vector<16x64xf32>
    %111 = vector.broadcast %20 : vector<1x64xf32> to vector<16x64xf32>
    %112 = arith.addf %110, %111 : vector<16x64xf32>
    %cst_39 = arith.constant 5.000000e-01 : f32
    %113 = vector.broadcast %cst_39 : f32 to vector<16x64xf32>
    %114 = arith.mulf %113, %112 : vector<16x64xf32>
    %cst_40 = arith.constant 4.471500e-02 : f32
    %115 = vector.broadcast %cst_40 : f32 to vector<16x64xf32>
    %116 = arith.mulf %115, %112 : vector<16x64xf32>
    %117 = arith.mulf %116, %112 : vector<16x64xf32>
    %118 = arith.mulf %117, %112 : vector<16x64xf32>
    %119 = arith.addf %112, %118 : vector<16x64xf32>
    %cst_41 = arith.constant 0.797884583 : f32
    %120 = vector.broadcast %cst_41 : f32 to vector<16x64xf32>
    %121 = arith.mulf %120, %119 : vector<16x64xf32>
    %122 = math.tanh %121 : vector<16x64xf32>
    %cst_42 = arith.constant 1.000000e+00 : f32
    %123 = vector.broadcast %cst_42 : f32 to vector<16x64xf32>
    %124 = arith.addf %123, %122 : vector<16x64xf32>
    %125 = arith.mulf %114, %124 : vector<16x64xf32>
    %126 = arith.truncf %125 : vector<16x64xf32> to vector<16x64xbf16>
    %cst_43 = arith.constant dense<0.000000e+00> : vector<16x32xf32>
    %127 = tpu.matmul %126, %16, %cst_43 {dimension_numbers = #tpu.dot_dimension_numbers<[1], [0], [0], [1], [0, 0, 1, 1], [], []>} : vector<16x64xbf16>, vector<64x32xbf16>, vector<16x32xf32> -> vector<16x32xf32>
    %128 = vector.broadcast %24 : vector<1x32xf32> to vector<16x32xf32>
    %129 = arith.addf %127, %128 : vector<16x32xf32>
    %130 = arith.addf %108, %129 : vector<16x32xf32>
    %cst_44 = arith.constant dense<0.000000e+00> : vector<16xf32>
    %131 = vector.multi_reduction <add>, %130, %cst_44 [1] : vector<16x32xf32> to vector<16xf32>
    %132 = vector.shape_cast %131 : vector<16xf32> to vector<16x1xf32>
    %cst_45 = arith.constant 3.200000e+01 : f32
    %133 = vector.broadcast %cst_45 : f32 to vector<16x1xf32>
    %134 = arith.divf %132, %133 : vector<16x1xf32>
    %135 = vector.broadcast %134 : vector<16x1xf32> to vector<16x32xf32>
    %136 = arith.subf %130, %135 : vector<16x32xf32>
    %137 = arith.mulf %136, %136 : vector<16x32xf32>
    %cst_46 = arith.constant dense<0.000000e+00> : vector<16xf32>
    %138 = vector.multi_reduction <add>, %137, %cst_46 [1] : vector<16x32xf32> to vector<16xf32>
    %139 = vector.shape_cast %138 : vector<16xf32> to vector<16x1xf32>
    %cst_47 = arith.constant 3.200000e+01 : f32
    %140 = vector.broadcast %cst_47 : f32 to vector<16x1xf32>
    %141 = arith.divf %139, %140 : vector<16x1xf32>
    %142 = vector.broadcast %134 : vector<16x1xf32> to vector<16x32xf32>
    %143 = arith.subf %130, %142 : vector<16x32xf32>
    %cst_48 = arith.constant 9.99999974E-6 : f32
    %144 = vector.broadcast %cst_48 : f32 to vector<16x1xf32>
    %145 = arith.addf %141, %144 : vector<16x1xf32>
    %146 = math.rsqrt %145 : vector<16x1xf32>
    %147 = vector.broadcast %146 : vector<16x1xf32> to vector<16x32xf32>
    %148 = arith.mulf %143, %147 : vector<16x32xf32>
    %149 = vector.broadcast %25 : vector<1x32xf32> to vector<16x32xf32>
    %150 = arith.mulf %148, %149 : vector<16x32xf32>
    %151 = vector.broadcast %26 : vector<1x32xf32> to vector<16x32xf32>
    %152 = arith.addf %150, %151 : vector<16x32xf32>
    %c0_49 = arith.constant 0 : index
    %c0_50 = arith.constant 0 : index
    %153 = vector.load %arg17[%c0_49, %c0_50] : memref<16x32xf32, #tpu.memory_space<vmem>>, vector<16x32xf32>
    tpu.vector_store %arg17[%c0_49, %c0_50], %152 {strides = array<i32>} : memref<16x32xf32, #tpu.memory_space<vmem>>, vector<16x32xf32>,
    %c1_i32 = arith.constant 1 : i32
    %154 = arith.cmpi eq, %arg0, %c1_i32 : i32
    %155 = arith.extui %154 : i1 to i32
    %c0_i32_51 = arith.constant 0 : i32
    %156 = arith.cmpi ne, %155, %c0_i32_51 : i32
    scf.if %156 {
      %157 = vector.shape_cast %152 : vector<16x32xf32> to vector<2x8x32xf32>
      %158 = vector.extract_strided_slice %157 {offsets = [0, 0, 0], sizes = [2, 1, 32], strides = [1, 1, 1]} : vector<2x8x32xf32> to vector<2x1x32xf32>
      %159 = vector.shape_cast %158 : vector<2x1x32xf32> to vector<2x32xf32>
      %c0_52 = arith.constant 0 : index
      %c0_53 = arith.constant 0 : index
      %160 = vector.load %arg8[%c0_52, %c0_53] : memref<2x48xf32, #tpu.memory_space<vmem>>, vector<2x48xf32>
      %161 = arith.truncf %160 : vector<2x48xf32> to vector<2x48xbf16>
      %c0_54 = arith.constant 0 : index
      %c0_55 = arith.constant 0 : index
      %162 = vector.load %arg10[%c0_54, %c0_55] : memref<48x16xbf16, #tpu.memory_space<vmem>>, vector<48x16xbf16>
      %cst_56 = arith.constant dense<0.000000e+00> : vector<2x16xf32>
      %163 = tpu.matmul %161, %162, %cst_56 {dimension_numbers = #tpu.dot_dimension_numbers<[1], [0], [0], [1], [0, 0, 1, 1], [], []>} : vector<2x48xbf16>, vector<48x16xbf16>, vector<2x16xf32> -> vector<2x16xf32>
      %c0_57 = arith.constant 0 : index
      %c0_58 = arith.constant 0 : index
      %164 = vector.load %arg11[%c0_57, %c0_58] : memref<1x16xf32, #tpu.memory_space<vmem>>, vector<1x16xf32>
      %165 = vector.broadcast %164 : vector<1x16xf32> to vector<2x16xf32>
      %166 = arith.addf %163, %165 : vector<2x16xf32>
      %167 = arith.truncf %159 : vector<2x32xf32> to vector<2x32xbf16>
      %c0_59 = arith.constant 0 : index
      %c0_60 = arith.constant 0 : index
      %168 = vector.load %arg12[%c0_59, %c0_60] : memref<32x2xbf16, #tpu.memory_space<vmem>>, vector<32x2xbf16>
      %cst_61 = arith.constant dense<0.000000e+00> : vector<2x2xf32>
      %169 = tpu.matmul %167, %168, %cst_61 {dimension_numbers = #tpu.dot_dimension_numbers<[1], [0], [0], [1], [0, 0, 1, 1], [], []>} : vector<2x32xbf16>, vector<32x2xbf16>, vector<2x2xf32> -> vector<2x2xf32>
      %170 = arith.truncf %166 : vector<2x16xf32> to vector<2x16xbf16>
      %c0_62 = arith.constant 0 : index
      %c0_63 = arith.constant 0 : index
      %171 = vector.load %arg13[%c0_62, %c0_63] : memref<16x2xbf16, #tpu.memory_space<vmem>>, vector<16x2xbf16>
      %cst_64 = arith.constant dense<0.000000e+00> : vector<2x2xf32>
      %172 = tpu.matmul %170, %171, %cst_64 {dimension_numbers = #tpu.dot_dimension_numbers<[1], [0], [0], [1], [0, 0, 1, 1], [], []>} : vector<2x16xbf16>, vector<16x2xbf16>, vector<2x2xf32> -> vector<2x2xf32>
      %173 = arith.addf %169, %172 : vector<2x2xf32>
      %c0_65 = arith.constant 0 : index
      %c0_66 = arith.constant 0 : index
      %174 = vector.load %arg14[%c0_65, %c0_66] : memref<1x2xf32, #tpu.memory_space<vmem>>, vector<1x2xf32>
      %175 = vector.broadcast %174 : vector<1x2xf32> to vector<2x2xf32>
      %176 = arith.addf %173, %175 : vector<2x2xf32>
      %c0_67 = arith.constant 0 : index
      %c0_68 = arith.constant 0 : index
      %177 = vector.load %arg15[%c0_67, %c0_68] : memref<2x2xf32, #tpu.memory_space<vmem>>, vector<2x2xf32>
      tpu.vector_store %arg15[%c0_67, %c0_68], %176 {strides = array<i32>} : memref<2x2xf32, #tpu.memory_space<vmem>>, vector<2x2xf32>,
      %cst_69 = arith.constant dense<0xFF800000> : vector<2xf32>
      %178 = vector.multi_reduction <maximumf>, %176, %cst_69 [1] : vector<2x2xf32> to vector<2xf32>
      %179 = vector.shape_cast %178 : vector<2xf32> to vector<2x1xf32>
      %180 = vector.broadcast %179 : vector<2x1xf32> to vector<2x2xf32>
      %181 = arith.subf %176, %180 : vector<2x2xf32>
      %182 = math.exp %181 : vector<2x2xf32>
      %cst_70 = arith.constant dense<0.000000e+00> : vector<2xf32>
      %183 = vector.multi_reduction <add>, %182, %cst_70 [1] : vector<2x2xf32> to vector<2xf32>
      %184 = vector.shape_cast %183 : vector<2xf32> to vector<2x1xf32>
      %185 = math.log %184 : vector<2x1xf32>
      %c0_71 = arith.constant 0 : index
      %c0_72 = arith.constant 0 : index
      %186 = vector.load %arg9[%c0_71, %c0_72] : memref<2x2xf32, #tpu.memory_space<vmem>>, vector<2x2xf32>
      %187 = vector.broadcast %185 : vector<2x1xf32> to vector<2x2xf32>
      %188 = arith.subf %181, %187 : vector<2x2xf32>
      %189 = arith.mulf %186, %188 : vector<2x2xf32>
      %cst_73 = arith.constant dense<0.000000e+00> : vector<2xf32>
      %190 = vector.multi_reduction <add>, %189, %cst_73 [1] : vector<2x2xf32> to vector<2xf32>
      %191 = vector.shape_cast %190 : vector<2xf32> to vector<2x1xf32>
      %cst_74 = arith.constant 0.000000e+00 : f32
      %192 = vector.broadcast %cst_74 : f32 to vector<2x1xf32>
      %193 = arith.subf %192, %191 : vector<2x1xf32>
      %cst_75 = arith.constant dense<0.000000e+00> : vector<1xf32>
      %194 = vector.multi_reduction <add>, %193, %cst_75 [0] : vector<2x1xf32> to vector<1xf32>
      %195 = vector.shape_cast %194 : vector<1xf32> to vector<1x1xf32>
      %cst_76 = arith.constant 5.000000e-01 : f32
      %196 = vector.broadcast %cst_76 : f32 to vector<1x1xf32>
      %197 = arith.mulf %195, %196 : vector<1x1xf32>
      %c0_77 = arith.constant 0 : index
      %c0_78 = arith.constant 0 : index
      %198 = vector.load %arg16[%c0_77, %c0_78] : memref<1x1xf32, #tpu.memory_space<vmem>>, vector<1x1xf32>
      tpu.vector_store %arg16[%c0_77, %c0_78], %197 {strides = array<i32>} : memref<1x1xf32, #tpu.memory_space<vmem>>, vector<1x1xf32>,
    } else {
    }
    return
  }
  func.func @transform_0(%arg0: i32) -> (i32, i32) {
    %c0_i32 = arith.constant 0 : i32
    %c0_i32_0 = arith.constant 0 : i32
    %c0_i32_1 = arith.constant 0 : i32
    return %c0_i32, %c0_i32_0 : i32, i32
  }
  func.func @transform_1(%arg0: i32) -> (i32, i32, i32) {
    %c0_i32 = arith.constant 0 : i32
    %c0_i32_0 = arith.constant 0 : i32
    %c0_i32_1 = arith.constant 0 : i32
    %c0_i32_2 = arith.constant 0 : i32
    return %c0_i32, %c0_i32_0, %c0_i32_1 : i32, i32, i32
  }
  func.func @transform_2(%arg0: i32) -> (i32, i32, i32) {
    %c0_i32 = arith.constant 0 : i32
    %c0_i32_0 = arith.constant 0 : i32
    %c0_i32_1 = arith.constant 0 : i32
    return %arg0, %c0_i32, %c0_i32_0 : i32, i32, i32
  }
  func.func @transform_3(%arg0: i32) -> (i32, i32, i32) {
    %c0_i32 = arith.constant 0 : i32
    %c0_i32_0 = arith.constant 0 : i32
    %c0_i32_1 = arith.constant 0 : i32
    return %arg0, %c0_i32, %c0_i32_0 : i32, i32, i32
  }
  func.func @transform_4(%arg0: i32) -> (i32, i32, i32) {
    %c0_i32 = arith.constant 0 : i32
    %c0_i32_0 = arith.constant 0 : i32
    %c0_i32_1 = arith.constant 0 : i32
    return %arg0, %c0_i32, %c0_i32_0 : i32, i32, i32
  }
  func.func @transform_5(%arg0: i32) -> (i32, i32, i32) {
    %c0_i32 = arith.constant 0 : i32
    %c0_i32_0 = arith.constant 0 : i32
    %c0_i32_1 = arith.constant 0 : i32
    return %arg0, %c0_i32, %c0_i32_0 : i32, i32, i32
  }
  func.func @transform_6(%arg0: i32) -> (i32, i32, i32) {
    %c0_i32 = arith.constant 0 : i32
    %c0_i32_0 = arith.constant 0 : i32
    %c0_i32_1 = arith.constant 0 : i32
    return %arg0, %c0_i32, %c0_i32_0 : i32, i32, i32
  }
  func.func @transform_7(%arg0: i32) -> (i32, i32) {
    %c0_i32 = arith.constant 0 : i32
    %c0_i32_0 = arith.constant 0 : i32
    %c0_i32_1 = arith.constant 0 : i32
    return %c0_i32, %c0_i32_0 : i32, i32
  }
  func.func @transform_8(%arg0: i32) -> (i32, i32) {
    %c0_i32 = arith.constant 0 : i32
    %c0_i32_0 = arith.constant 0 : i32
    %c0_i32_1 = arith.constant 0 : i32
    return %c0_i32, %c0_i32_0 : i32, i32
  }
  func.func @transform_9(%arg0: i32) -> (i32, i32) {
    %c0_i32 = arith.constant 0 : i32
    %c0_i32_0 = arith.constant 0 : i32
    %c0_i32_1 = arith.constant 0 : i32
    return %c0_i32, %c0_i32_0 : i32, i32
  }
  func.func @transform_10(%arg0: i32) -> (i32, i32) {
    %c0_i32 = arith.constant 0 : i32
    %c0_i32_0 = arith.constant 0 : i32
    %c0_i32_1 = arith.constant 0 : i32
    return %c0_i32, %c0_i32_0 : i32, i32
  }
  func.func @transform_11(%arg0: i32) -> (i32, i32) {
    %c0_i32 = arith.constant 0 : i32
    %c0_i32_0 = arith.constant 0 : i32
    %c0_i32_1 = arith.constant 0 : i32
    return %c0_i32, %c0_i32_0 : i32, i32
  }
  func.func @transform_12(%arg0: i32) -> (i32, i32) {
    %c0_i32 = arith.constant 0 : i32
    %c0_i32_0 = arith.constant 0 : i32
    %c0_i32_1 = arith.constant 0 : i32
    return %c0_i32, %c0_i32_0 : i32, i32
  }
  func.func @transform_13(%arg0: i32) -> (i32, i32) {
    %c0_i32 = arith.constant 0 : i32
    %c0_i32_0 = arith.constant 0 : i32
    %c0_i32_1 = arith.constant 0 : i32
    return %c0_i32, %c0_i32_0 : i32, i32
  }
  func.func @transform_14(%arg0: i32) -> (i32, i32) {
    %c0_i32 = arith.constant 0 : i32
    %c0_i32_0 = arith.constant 0 : i32
    %c0_i32_1 = arith.constant 0 : i32
    return %c0_i32, %c0_i32_0 : i32, i32
  }
  func.func @transform_15(%arg0: i32) -> (i32, i32) {
    %c0_i32 = arith.constant 0 : i32
    %c0_i32_0 = arith.constant 0 : i32
    %c0_i32_1 = arith.constant 0 : i32
    return %c0_i32, %c0_i32_0 : i32, i32
  }
}

</mosaic_0001>

<bundles_post_ra>
// kernel: tpu_custom_call.1
= control target key start
LH: loop header
LB: loop body
LE: loop exit
PB: predicated region body
PF: predicated region fallthrough
CT: control target
= control target key end

     0   :  { %s2640_s0 = inlined_call_operand.vmem [shape: f32[16,32], index: 0, kind: input, shape index: {}]   ;;  %s2641_s1 = inlined_call_operand.hbm [shape: f32[2,1,8], index: 1, kind: input, shape index: {}]   ;;  %s2642_s2 = inlined_call_operand.vmem [shape: bf16[2,32,96], index: 2, kind: input, shape index: {}]   ;;  %s2643_s3 = inlined_call_operand.vmem [shape: bf16[2,32,32], index: 3, kind: input, shape index: {}]   ;;  %s2644_s4 = inlined_call_operand.vmem [shape: bf16[2,32,64], index: 4, kind: input, shape index: {}]   ;;  %s2645_s5 = inlined_call_operand.vmem [shape: bf16[2,64,32], index: 5, kind: input, shape index: {}]   ;;  %s2646_s6 = inlined_call_operand.vmem [shape: f32[2,8,96], index: 6, kind: input, shape index: {}]   ;;  %s2647_s7 = inlined_call_operand.vmem [shape: f32[2,48], index: 7, kind: input, shape index: {}]   ;;  %s2648_s8 = inlined_call_operand.vmem [shape: f32[2,2], index: 8, kind: input, shape index: {}]   ;;  %s2649_s9 = inlined_call_operand.vmem [shape: bf16[48,16], index: 9, kind: input, shape index: {}]   ;;  %s2650_s10 = inlined_call_operand.vmem [shape: f32[1,16], index: 10, kind: input, shape index: {}]   ;;  %s2651_s11 = inlined_call_operand.vmem [shape: bf16[32,2], index: 11, kind: input, shape index: {}]   ;;  %s2652_s12 = inlined_call_operand.vmem [shape: bf16[16,2], index: 12, kind: input, shape index: {}]   ;;  %s2653_s13 = inlined_call_operand.vmem [shape: f32[1,2], index: 13, kind: input, shape index: {}]   ;;  %s2654_s14 = inlined_call_operand.hbm [shape: f32[2,2], index: 14, kind: output, shape index: {0}]   ;;  %s2655_s15 = inlined_call_operand.hbm [shape: f32[1,1], index: 15, kind: output, shape index: {1}]  }
   0x1   :  { %2661 = sst [smem:[#allocation13_spill]] %s2641_s1 }
   0x2   :  { %2662 = sst [smem:[#allocation14_spill]] %s2648_s8 }
   0x3   :  { %2663 = sst [smem:[#allocation15_spill]] %s2654_s14 }
   0x4   :  { %2664 = sst [smem:[#allocation16_spill]] %s2655_s15 }
   0x5   :  { %21 = vsyncpa [#allocation4], 0 }
   0x6   :  { %22 = vsyncpa [#allocation5], 0 }
   0x7   :  { %23 = vsyncpa [#allocation8], 0  ;;  %s2326_s18 = smov 0  }
   0x8 LB: > { %2665 = sst [smem:[#allocation12_spill]] %s2229_s18  ;;  %s2332_s19 = sadd.s32 4294967295, %s2229_s18   ;;  %s2229_s18 = sphi %s2326_s18, %s29_s18  }
   0x9   : > { %p1822_p0 = scmp.ge.s32.totalorder %s2229_s18, 1  ;;  %p395_p1 = scmp.lt.s32.totalorder %s2229_s18, 3 }
   0xa   : > { %s2231_s20 = smov [#allocation3]   ;;  %p2656_p4 = scmp.eq.s32.totalorder %s2332_s19, 0 }
   0xb   : > { %s410_s21 = sshll.u32 %s2231_s20, 4  ;;  %p2337_p3 = pnand %p1822_p0, %p395_p1  ;;  %s411_s21 = int_to_ptr.vmem [resolvable:$true] %s410_s21 }
   0xc   : > { %s2668_s1 = sld [smem:[#allocation13_spill]] }
   0xd   : > { %s2666_s22 = scalar_select %p2337_p3, 1, 0 }
   0xe   : > { %p2050_p5 = pneg %p2337_p3 }
  0x10   : > { %p2346_p6 = pnand %p2656_p4, %p2050_p5 }
  0x12   : > { %s2131_s26 = scalar_lea.hbm %s2668_s1, 32  ;;  %p2133_p8 = pneg %p2346_p6 }
  0x13   : > { %p2132_p7 = scmp.ne.s32.totalorder %s2668_s1, %s2131_s26  ;;  %p2138_p11 = scmp.lt.u32.totalorder %s2131_s26, %s2668_s1 }
  0x15   : > { %p2134_p9 = pnand %p2133_p8, %p2132_p7 }
  0x17   : > { %p2135_p10 = pneg %p2134_p9 }
  0x19   : > { %p2140_p12 = pnand %p2138_p11, %p2135_p10 }
  0x1b   : > { %2143 = shalt.err (!%p2140_p12)
}
  0x1c   : > { %s2144_s16 = scalar_lea.vmem %s411_s21, 32  ;;  %p2152_p5 = scmp.lt.s32.totalorder %s411_s21, %s411_s21 }
  0x1d   : > { %p2145_p13 = scmp.ne.s32.totalorder %s411_s21, %s2144_s16  ;;  %p2153_p2 = scmp.lt.s32.totalorder %s2144_s16, %s2144_s16 }
  0x1f   : > { %p2147_p0 = pnand %p2145_p13, %p2133_p8  ;;  %p2154_p4 = por %p2153_p2, %p2152_p5 }
  0x21   : > { %p2148_p1 = pneg %p2147_p0 }
  0x23   : > { %p2155_p3 = pnand %p2154_p4, %p2148_p1 }
  0x25   : > { %2158 = shalt.err (!%p2155_p3)
}
  0x26   : > { %s2232_s17 = smov 16   ;;  %s2233_s20 = smov 1  }
  0x27   : > { %2053 = dma.hbm_to_vmem [thread:$0]  (!%p2346_p6), %s2668_s1, 32, %s411_s21, [#allocation4], %s2232_s17, %s2232_s17, %s2233_s20  }
  0x28   : > { %p2669_p7 = scmp.ne.s32.totalorder %s2666_s22, 0 }
  0x29   : > { %p2670_p9 = scmp.eq.s32.totalorder (!%p2669_p7), %s2332_s19, 0 }
  0x2a   : > { %486 = sbr.rel (%p2669_p7) target bundleno = 3885 (0xf2d), region = 76 }
  0x31   : > { %2216 = dma.done.wait (%p2670_p9), [#allocation4], 32   ;;  %p2671_p8 = pmov %p2670_p9 }
  0x32   : > { %p548_p2 = scmp.lt.s32.totalorder %s2332_s19, 1  ;;  %p2672_p3 = scmp.ne.s32.totalorder %s2332_s19, 0 }
  0x33   : > { %2218 = vsyncadd (%p2671_p8), [#allocation4], 4294967264  ;;  %v577_v0 = vld [vmem:[%s2640_s0] sm:$0xff] (!%p2672_p3)  ;;  %vm579_vm0 = vcmask (!%p2672_p3), 261120   ;;  %v578_v1 = vld [vmem:[%s2640_s0 + $0x8] sm:$0xff] (!%p2672_p3) }
  0x34   : > { %s549_s26 = scalar_select %p548_p2, %s2332_s19, 1 }
  0x35   : > { %576 = sbr.rel (%p2672_p3) target bundleno = 60 (0x3c), region = 84  ;;  %580 = vst.msk [vmem:[#allocation2] sm:$0xff] (!%p2672_p3), %vm579_vm0, %v577_v0  ;;  %581 = vst.msk [vmem:[#allocation2 + $0x8] sm:$0xff] (!%p2672_p3), %vm579_vm0, %v578_v1 }
  0x36   : > { %s1883_s27 = sshll.u32 %s549_s26, 4  ;;  %s1886_s28 = sshll.u32 %s549_s26, 5 }
  0x37   : > { %s552_s30 = scalar_lea.vmem %s2642_s2, %s1883_s27  ;;  %s2380_s22 = scalar_lea.vmem %s2643_s3, %s1883_s27 }
  0x38   : > { %s2385_s24 = scalar_lea.vmem %s2644_s4, %s1883_s27  ;;  %s2390_s18 = scalar_lea.vmem %s2645_s5, %s1886_s28 }
  0x39   : > { %s1835_s15 = sshll.u32 %s549_s26, 3 }
  0x3a   : > { %s571_s23 = scalar_lea.vmem %s2646_s6, %s1835_s15 }
  0x3c PF: > { %v2083_v2 = vld [vmem:[%s552_s30] sm:$0xff]   ;;  %v2234_v3 = vmov 0.0   ;;  %v2084_v4 = vld [vmem:[%s552_s30 + $0x8] sm:$0xff]   ;;  %vm2235_vm1 = vmmov 0   ;;  %vm628_vm2 = vcmask 261120   ;;  %v612_v8 = vlaneseq  ;;  %s2236_s1 = smov 96  }
  0x3d   : > { %1930 = vmatprep.subr.bf16.mxu0 %v2234_v3  ;;  %1938 = vmatprep.subr.bf16.mxu1 %v2234_v3  ;;  %v2407_v5 = vld [vmem:[#allocation2] sm:$0xff]  ;;  %v2409_v6 = vld [vmem:[#allocation2 + $0x8] sm:$0xff]  ;;  %vm681_vm3 = vcmask 130048   ;;  %v584_v25 = vld [vmem:[#allocation3] sm:$0x1]  ;;  %vm792_vm4 = vcmask 64512  }
  0x3e   : > { %1931 = vmatpush3.bf16.msra.mxu0 %v2083_v2  ;;  %1934 = vmatprep.mubr.msk.bf16.mxu0 %vm2235_vm1, %v2234_v3  ;;  %v611_v7 = vpack.c.bf16 %v2409_v6, %v2407_v5  ;;  %v2420_v9 = vshrl.u32 %v612_v8, 7  ;;  %v2423_v11 = vld [vmem:[%s571_s23] sm:$0xff]  ;;  %v1837_v26 = vadd.f32 -1.0, %v584_v25  ;;  %v585_v27 = vld [vmem:[#allocation3 + $0x1] sm:$0x1]  ;;  %s2237_s8 = smov 64  }
  0x3f   : > { %1932 = vmatprep.subr.bf16.mxu0 %v2234_v3  ;;  %1940 = vmatprep.mubr.msk.bf16.mxu1 %vm2235_vm1, %v2234_v3  ;;  %v1838_v29 = vadd.f32 -1.0, %v585_v27  ;;  %s2238_s14 = smov 80   ;;  %vm822_vm5 = vcmask 1043456   ;;  %s2239_s15 = smov 112   ;;  %vm1365_vm6 = vcmask 523264  }
  0x40   : > { %v614_v10 = vsub.s32 0, %v2420_v9  ;;  %v588_v28 = vmul.f32 1e+09, %v1837_v26  ;;  %s2240_s26 = smov 48   ;;  %s2241_s28 = smov 16  }
  0x41   : > { %v589_v31 = vmul.f32 1e+09, %v1838_v29  ;;  %p1865_p4 = scmp.ne.s32.totalorder %s2332_s19, 1 }
  0x42   : > { %1933 = vmatpush3.bf16.msra.mxu0 %v2084_v4  ;;  %v615_v12 = vrot.slane %v2423_v11, %v614_v10  ;;  %v2444_v30 = vrot.slane %v588_v28, %v614_v10  ;;  %vm2243_vm7 = vmmov (!%p1865_p4), 0   ;;  %vm1489_vm8 = vcmask (!%p1865_p4), 392192  }
  0x43   : > { %1944 = vmatprep.subr.bf16.mxu0 %v2234_v3  ;;  %v2447_v38 = vrot.slane %v589_v31, %v614_v10  ;;  %vm1596_vm9 = vcmask (!%p1865_p4), 1041409   ;;  %vm1662_vm10 = vcmask (!%p1865_p4), 9216   ;;  %vm1682_vm11 = vcmask (!%p1865_p4), 1041408  }
  0x44   : > { %vm1691_vm12 = vcmask (!%p1865_p4), 0  }
  0x45   : > { %1935 = vmatmul.mubr.msk.bf16.vlgmr.msra.gmra.mrb[0].mxu0 %vm628_vm2, %v611_v7 }
  0x46   : > { %1946 = vmatprep.mubr.msk.bf16.mxu0 %vm2235_vm1, %v2234_v3 }
 0x118   : > { %v666_v13 = vpop.f32.mrb[0].mxu0 }
 0x119   : > { %v667_v14 = vadd.f32 %v666_v13, %v615_v12  ;;  %v1936_v15 = vpop.f32.mrb[1].mxu0 }
 0x11a   : > { %v669_v16 = vpop.f32.mrb[2].mxu0 }
 0x11b   : > { %v2426_v17 = vpack.c.bf16 %v667_v14, %v667_v14  ;;  %v670_v18 = vadd.f32 %v669_v16, %v615_v12  ;;  %v1937_v19 = vpop.f32.mrb[3].mxu0 }
 0x11d   : > { %679 = vrot.lane.b32.xlu0 %v2426_v17, %s2236_s1  ;;  %v2429_v20 = vpack.c.bf16 %v670_v18, %v670_v18 }
 0x121   : > { %728 = vrot.lane.b32.xlu0 %v2429_v20, %s2236_s1 }
 0x18f   : > { %v680_v21 = vpop.permute.xlu0 %679 }
 0x190   : > { %v686_v22 = vsel %vm681_vm3, %v680_v21, 0 }
 0x191   : > { %1939 = vmatpush3.bf16.xpose.msra.mxu1 %v686_v22 }
 0x192   : > { %1950 = vmatprep.subr.bf16.mxu1 %v2234_v3 }
 0x193   : > { %v729_v23 = vpop.permute.xlu0 %728 }
 0x194   : > { %v734_v24 = vsel %vm681_vm3, %v729_v23, 0 }
 0x195   : > { %1945 = vmatpush3.bf16.xpose.msra.mxu0 %v734_v24 }
 0x196   : > { %1956 = vmatprep.subr.bf16.mxu0 %v2234_v3 }
 0x198   : > { %1941 = vmatmul.mubr.msk.bf16.vlgmr.msra.gmra.mrb[0].mxu1 %vm681_vm3, %v2426_v17 }
 0x199   : > { %1952 = vmatprep.mubr.msk.bf16.mxu1 %vm2235_vm1, %v2234_v3 }
 0x19c   : > { %1947 = vmatmul.mubr.msk.bf16.vlgmr.msra.gmra.mrb[4].mxu0 %vm681_vm3, %v2429_v20 }
 0x19d   : > { %1958 = vmatprep.mubr.msk.bf16.mxu0 %vm2235_vm1, %v2234_v3 }
 0x26b   : > { %v722_v32 = vpop.f32.mrb[0].mxu1 }
 0x26c   : > { %v776_v33 = vmul.f32 0.25, %v722_v32  ;;  %v1942_v34 = vpop.f32.mrb[1].mxu1 }
 0x26d   : > { %v725_v35 = vpop.f32.mrb[2].mxu1 }
 0x26e   : > { %v1943_v36 = vpop.f32.mrb[3].mxu1  ;;  %v790_v37 = vadd.f32 %v2444_v30, %v776_v33 }
 0x26f   : > { %v770_v39 = vpop.f32.mrb[4].mxu0 }
 0x270   : > { %v777_v40 = vmul.f32 0.25, %v770_v39  ;;  %v1948_v41 = vpop.f32.mrb[5].mxu0  ;;  %v793_v42 = vsel %vm792_vm4, %v790_v37, -inf }
 0x271   : > { %794 = vmax.xlane.f32.xlu1 %v793_v42  ;;  %v773_v43 = vpop.f32.mrb[6].mxu0 }
 0x272   : > { %v1949_v44 = vpop.f32.mrb[7].mxu0  ;;  %v791_v45 = vadd.f32 %v2447_v38, %v777_v40 }
 0x274   : > { %v796_v46 = vsel %vm792_vm4, %v791_v45, -inf }
 0x275   : > { %797 = vmax.xlane.f32.xlu1 %v796_v46 }
 0x286   : > { %817 = vrot.lane.b32.xlu1 %v2426_v17, %s2237_s8 }
 0x28a   : > { %866 = vrot.lane.b32.xlu1 %v2429_v20, %s2237_s8 }
 0x28e   : > { %918 = vrot.lane.b32.xlu1 %v2426_v17, %s2238_s14 }
 0x2fe   : > { %v795_v47 = vpop.xlane.xlu1 %794 }
 0x2ff   : > { %v799_v48 = vsub.f32 %v790_v37, %v795_v47 }
 0x301   : > { %v801_v49 = vmul.f32 1.442695, %v799_v48 }
 0x302   : > { %v798_v50 = vpop.xlane.xlu1 %797 }
 0x303   : > { %2093 = vpow2.f32 %v801_v49  ;;  %v800_v51 = vsub.f32 %v791_v45, %v798_v50 }
 0x305   : > { %v803_v52 = vmul.f32 1.442695, %v800_v51 }
 0x306   : > { %v818_v53 = vpop.permute.xlu1 %817 }
 0x307   : > { %2095 = vpow2.f32 %v803_v52  ;;  %v824_v54 = vsel %vm822_vm5, %v818_v53, 0 }
 0x308   : > { %1951 = vmatpush3.bf16.msra.mxu1 %v824_v54 }
 0x309   : > { %1962 = vmatprep.subr.bf16.mxu1 %v2234_v3 }
 0x30a   : > { %v867_v55 = vpop.permute.xlu1 %866 }
 0x30b   : > { %v872_v56 = vsel %vm822_vm5, %v867_v55, 0 }
 0x30c   : > { %1957 = vmatpush3.bf16.msra.mxu0 %v872_v56 }
 0x30d   : > { %v2094_v57 = vpop.eup %2093  ;;  %1968 = vmatprep.subr.bf16.mxu0 %v2234_v3 }
 0x30e   : > { %v805_v58 = vsel %vm792_vm4, %v2094_v57, 0.0  ;;  %v919_v61 = vpop.permute.xlu1 %918 }
 0x30f   : > { %806 = vadd.xlane.f32.xlu0 %v805_v58  ;;  %v924_v7 = vsel %vm681_vm3, %v919_v61, 0  ;;  %v2085_v61 = vld [vmem:[%s2380_s22] sm:$0xff]  }
 0x311   : > { %v2096_v59 = vpop.eup %2095 }
 0x312   : > { %v808_v60 = vsel %vm792_vm4, %v2096_v59, 0.0 }
 0x313   : > { %809 = vadd.xlane.f32.xlu1 %v808_v60 }
 0x324   : > { %968 = vrot.lane.b32.xlu1 %v2429_v20, %s2238_s14 }
 0x325   : > { %916 = vrot.lane.b32.xlu0 %v2426_v17, %s2239_s15 }
 0x328   : > { %966 = vrot.lane.b32.xlu1 %v2429_v20, %s2239_s15 }
 0x39c   : > { %v807_v62 = vpop.xlane.xlu0 %806 }
 0x39d   : > { %2097 = vrcp.f32 %v807_v62  ;;  %v2086_v62 = vld [vmem:[%s2380_s22 + $0x8] sm:$0xff]   ;;  %s2673_s22 = sld [smem:[#allocation14_spill]] (!%p1865_p4) }
 0x3a0   : > { %v810_v63 = vpop.xlane.xlu1 %809  ;;  %v917_v14 = vpop.permute.xlu0 %916 }
 0x3a1   : > { %2099 = vrcp.f32 %v810_v63 }
 0x3a4   : > { %v969_v10 = vpop.permute.xlu1 %968 }
 0x3a5   : > { %v974_v13 = vsel %vm681_vm3, %v969_v10, 0 }
 0x3a7   : > { %v2098_v0 = vpop.eup %2097 }
 0x3a8   : > { %v813_v1 = vmul.f32 %v2098_v0, %v2094_v57  ;;  %v967_v15 = vpop.permute.xlu1 %966 }
 0x3aa   : > { %v815_v2 = vpack.c.bf16 %v813_v1, %v813_v1 }
 0x3ab   : > { %v2100_v4 = vpop.eup %2099 }
 0x3ac   : > { %v814_v8 = vmul.f32 %v2100_v4, %v2096_v59  ;;  %1953 = vmatmul.mubr.msk.bf16.vlgmr.msra.gmra.mrb[4].mxu1 %vm792_vm4, %v815_v2 }
 0x3ad   : > { %1963 = vmatpush3.bf16.xpose.msra.mxu1 %v924_v7  ;;  %1964 = vmatprep.mubr.msk.bf16.mxu1 %vm2235_vm1, %v2234_v3 }
 0x3ae   : > { %v816_v12 = vpack.c.bf16 %v814_v8, %v814_v8  ;;  %1974 = vmatprep.subr.bf16.mxu1 %v2234_v3 }
 0x3b0   : > { %1959 = vmatmul.mubr.msk.bf16.vlgmr.msra.gmra.mrb[8].mxu0 %vm792_vm4, %v816_v12 }
 0x3b1   : > { %1969 = vmatpush3.bf16.xpose.msra.mxu0 %v974_v13  ;;  %1970 = vmatprep.mubr.msk.bf16.mxu0 %vm2235_vm1, %v2234_v3 }
 0x3b2   : > { %1980 = vmatprep.subr.bf16.mxu0 %v2234_v3 }
 0x3b4   : > { %1965 = vmatmul.mubr.msk.bf16.vlgmr.msra.gmra.mrb[8].mxu1 %vm681_vm3, %v917_v14 }
 0x3b5   : > { %1976 = vmatprep.mubr.msk.bf16.mxu1 %vm2235_vm1, %v2234_v3 }
 0x3b8   : > { %1971 = vmatmul.mubr.msk.bf16.vlgmr.msra.gmra.mrb[12].mxu0 %vm681_vm3, %v967_v15  ;;  %v1159_v15 = vsub.s32 2, %v2420_v9 }
 0x3b9   : > { %1982 = vmatprep.mubr.msk.bf16.mxu0 %vm2235_vm1, %v2234_v3 }
 0x47f   : > { %v2480_v16 = vpop.f32.mrb[4].mxu1 }
 0x480   : > { %v1954_v18 = vpop.f32.mrb[5].mxu1 }
 0x481   : > { %v863_v19 = vpop.f32.mrb[6].mxu1  ;;  %v1160_v18 = vrot.slane %v2423_v11, %v1159_v15 }
 0x482   : > { %v1955_v21 = vpop.f32.mrb[7].mxu1 }
 0x483   : > { %v2482_v22 = vpop.f32.mrb[8].mxu0 }
 0x484   : > { %v1889_v23 = vpack.c.bf16 %v2482_v22, %v2480_v16  ;;  %v1960_v24 = vpop.f32.mrb[9].mxu0 }
 0x485   : > { %v911_v25 = vpop.f32.mrb[10].mxu0 }
 0x486   : > { %v1961_v26 = vpop.f32.mrb[11].mxu0 }
 0x487   : > { %v960_v27 = vpop.f32.mrb[8].mxu1 }
 0x488   : > { %v1016_v28 = vmul.f32 0.25, %v960_v27  ;;  %v1966_v29 = vpop.f32.mrb[9].mxu1 }
 0x489   : > { %v963_v31 = vpop.f32.mrb[10].mxu1 }
 0x48a   : > { %v1967_v32 = vpop.f32.mrb[11].mxu1  ;;  %v1018_v33 = vadd.f32 %v1016_v28, %v2444_v30 }
 0x48b   : > { %v1010_v34 = vpop.f32.mrb[12].mxu0 }
 0x48c   : > { %v1017_v35 = vmul.f32 0.25, %v1010_v34  ;;  %v1972_v36 = vpop.f32.mrb[13].mxu0  ;;  %v1020_v37 = vsel %vm792_vm4, %v1018_v33, -inf }
 0x48d   : > { %1021 = vmax.xlane.f32.xlu1 %v1020_v37  ;;  %v1013_v39 = vpop.f32.mrb[14].mxu0 }
 0x48e   : > { %v1973_v40 = vpop.f32.mrb[15].mxu0  ;;  %v1019_v41 = vadd.f32 %v1017_v35, %v2447_v38 }
 0x48f   : > { %v2088_v40 = vld [vmem:[%s2385_s24 + $0x8] sm:$0xff]  }
 0x490   : > { %v1023_v42 = vsel %vm792_vm4, %v1019_v41, -inf }
 0x491   : > { %1024 = vmax.xlane.f32.xlu0 %v1023_v42 }
 0x4a7   : > { %1092 = vrot.lane.b32.xlu0 %v2429_v20, %s2240_s26 }
 0x51a   : > { %v1022_v43 = vpop.xlane.xlu1 %1021 }
 0x51b   : > { %v1026_v44 = vsub.f32 %v1018_v33, %v1022_v43 }
 0x51d   : > { %v1028_v45 = vmul.f32 1.442695, %v1026_v44 }
 0x51e   : > { %v1025_v30 = vpop.xlane.xlu0 %1024 }
 0x51f   : > { %2101 = vpow2.f32 %v1028_v45  ;;  %v1027_v46 = vsub.f32 %v1019_v41, %v1025_v30 }
 0x521   : > { %v1030_v47 = vmul.f32 1.442695, %v1027_v46  ;;  %v1247_v46 = vsub.s32 3, %v2420_v9 }
 0x522   : > { %v1093_v48 = vpop.permute.xlu0 %1092 }
 0x523   : > { %2103 = vpow2.f32 %v1030_v47  ;;  %v1098_v49 = vsel %vm822_vm5, %v1093_v48, 0  ;;  %v1248_v47 = vrot.slane %v2423_v11, %v1247_v46  ;;  %v1253_v48 = vsub.s32 4, %v2420_v9 }
 0x524   : > { %1981 = vmatpush3.bf16.msra.mxu0 %v1098_v49 }
 0x525   : > { %1994 = vmatprep.subr.bf16.mxu0 %v2234_v3 }
 0x529   : > { %v2102_v38 = vpop.eup %2101 }
 0x52a   : > { %v1032_v50 = vsel %vm792_vm4, %v2102_v38, 0.0 }
 0x52b   : > { %1033 = vadd.xlane.f32.xlu1 %v1032_v50 }
 0x52d   : > { %v2104_v51 = vpop.eup %2103 }
 0x52e   : > { %v1035_v20 = vsel %vm792_vm4, %v2104_v51, 0.0 }
 0x52f   : > { %1036 = vadd.xlane.f32.xlu1 %v1035_v20 }
 0x540   : > { %1044 = vrot.lane.b32.xlu1 %v2426_v17, %s2240_s26 }
 0x5b8   : > { %v1034_v52 = vpop.xlane.xlu1 %1033 }
 0x5b9   : > { %2105 = vrcp.f32 %v1034_v52  ;;  %v1254_v52 = vrot.slane %v2423_v11, %v1253_v48 }
 0x5bc   : > { %v1037_v53 = vpop.xlane.xlu1 %1036 }
 0x5bd   : > { %2107 = vrcp.f32 %v1037_v53 }
 0x5c0   : > { %v1045_v54 = vpop.permute.xlu1 %1044 }
 0x5c1   : > { %v1050_v55 = vsel %vm822_vm5, %v1045_v54, 0 }
 0x5c2   : > { %1975 = vmatpush3.bf16.msra.mxu1 %v1050_v55 }
 0x5c3   : > { %v2106_v56 = vpop.eup %2105  ;;  %1986 = vmatprep.subr.bf16.mxu1 %v2234_v3 }
 0x5c4   : > { %v1040_v57 = vmul.f32 %v2106_v56, %v2102_v38 }
 0x5c6   : > { %v1042_v58 = vpack.c.bf16 %v1040_v57, %v1040_v57  ;;  %v2089_v57 = vld [vmem:[%s2390_s18] sm:$0xff]  }
 0x5c7   : > { %v2108_v59 = vpop.eup %2107 }
 0x5c8   : > { %v1041_v60 = vmul.f32 %v2108_v59, %v2104_v51  ;;  %1977 = vmatmul.mubr.msk.bf16.vlgmr.msra.gmra.mrb[12].mxu1 %vm792_vm4, %v1042_v58  ;;  %v2090_v58 = vld [vmem:[%s2390_s18 + $0x8] sm:$0xff]   ;;  %v2091_v59 = vld [vmem:[%s2390_s18 + $0x10] sm:$0xff]  }
 0x5c9   : > { %1990 = vmatprep.mubr.msk.bf16.mxu1 %vm2235_vm1, %v2234_v3  ;;  %1987 = vmatpush3.bf16.msra.mxu1 %v2085_v61 }
 0x5ca   : > { %v1043_v17 = vpack.c.bf16 %v1041_v60, %v1041_v60  ;;  %1988 = vmatprep.subr.bf16.mxu1 %v2234_v3  ;;  %v2092_v60 = vld [vmem:[%s2390_s18 + $0x18] sm:$0xff]  }
 0x5cc   : > { %1983 = vmatmul.mubr.msk.bf16.vlgmr.msra.gmra.mrb[16].mxu0 %vm792_vm4, %v1043_v17  ;;  %v1260_v17 = vsub.s32 1, %v2420_v9 }
 0x5cd   : > { %1998 = vmatprep.mubr.msk.bf16.mxu0 %vm2235_vm1, %v2234_v3  ;;  %1989 = vmatpush3.bf16.msra.mxu1 %v2086_v62 }
 0x5ce   : > { %2002 = vmatprep.subr.bf16.mxu1 %v2234_v3  ;;  %v1261_v61 = vrot.slane %v2423_v11, %v1260_v17 }
 0x69b   : > { %v1086_v63 = vpop.f32.mrb[12].mxu1 }
 0x69c   : > { %v1978_v0 = vpop.f32.mrb[13].mxu1 }
 0x69d   : > { %v1089_v1 = vpop.f32.mrb[14].mxu1 }
 0x69e   : > { %v1979_v2 = vpop.f32.mrb[15].mxu1 }
 0x69f   : > { %v1134_v4 = vpop.f32.mrb[16].mxu0 }
 0x6a0   : > { %v1890_v7 = vpack.c.bf16 %v1134_v4, %v1086_v63  ;;  %v1984_v8 = vpop.f32.mrb[17].mxu0 }
 0x6a1   : > { %v1137_v10 = vpop.f32.mrb[18].mxu0 }
 0x6a2   : > { %1152 = vrot.lane.b32.xlu1 %v1890_v7, %s2241_s28  ;;  %v1985_v12 = vpop.f32.mrb[19].mxu0 }
 0x714   : > { %v1153_v13 = vpop.permute.xlu1 %1152 }
 0x715   : > { %v1156_v14 = vsel %vm681_vm3, %v1889_v23, %v1153_v13 }
 0x716   : > { %1991 = vmatmul.mubr.msk.bf16.vlgmr.msra.gmra.mrb[16].mxu1 %vm628_vm2, %v1156_v14 }
 0x717   : > { %2010 = vmatprep.mubr.msk.bf16.mxu1 %vm2235_vm1, %v2234_v3  ;;  %2003 = vmatpush3.bf16.msra.mxu1 %v2089_v57 }
 0x718   : > { %2004 = vmatprep.subr.bf16.mxu1 %v2234_v3 }
 0x71b   : > { %2005 = vmatpush3.bf16.msra.mxu1 %v2090_v58 }
 0x71c   : > { %2006 = vmatprep.subr.bf16.mxu1 %v2234_v3 }
 0x71f   : > { %2007 = vmatpush3.bf16.msra.mxu1 %v2091_v59 }
 0x720   : > { %2008 = vmatprep.subr.bf16.mxu1 %v2234_v3 }
 0x723   : > { %2009 = vmatpush3.bf16.msra.mxu1 %v2092_v60 }
 0x7e9   : > { %v1209_v19 = vpop.f32.mrb[16].mxu1 }
 0x7ea   : > { %v1210_v21 = vadd.f32 %v1209_v19, %v1160_v18  ;;  %v1992_v24 = vpop.f32.mrb[17].mxu1 }
 0x7eb   : > { %v1212_v25 = vpop.f32.mrb[18].mxu1 }
 0x7ec   : > { %v1213_v26 = vadd.f32 %v1212_v25, %v1160_v18  ;;  %v1993_v27 = vpop.f32.mrb[19].mxu1  ;;  %v1216_v28 = vadd.f32 %v1210_v21, %v2407_v5 }
 0x7ee   : > { %v1218_v16 = vsel %vm628_vm2, %v1216_v28, 0.0  ;;  %v1217_v22 = vadd.f32 %v1213_v26, %v2409_v6  ;;  %v2087_v6 = vld [vmem:[%s2385_s24] sm:$0xff]  }
 0x7ef   : > { %1219 = vadd.xlane.f32.xlu1 %v1218_v16  ;;  %1995 = vmatpush3.bf16.msra.mxu0 %v2087_v6 }
 0x7f0   : > { %v1221_v23 = vsel %vm628_vm2, %v1217_v22, 0.0  ;;  %1996 = vmatprep.subr.bf16.mxu0 %v2234_v3 }
 0x7f1   : > { %1222 = vadd.xlane.f32.xlu0 %v1221_v23 }
 0x7f3   : > { %1997 = vmatpush3.bf16.msra.mxu0 %v2088_v40 }
 0x87c   : > { %v1220_v29 = vpop.xlane.xlu1 %1219 }
 0x87d   : > { %v1225_v31 = vmul.f32 0.03125, %v1220_v29  ;;  %v1339_v29 = vsub.s32 5, %v2420_v9 }
 0x87e   : > { %v1223_v32 = vpop.xlane.xlu0 %1222 }
 0x87f   : > { %v1227_v33 = vsub.f32 %v1216_v28, %v1225_v31  ;;  %v1226_v34 = vmul.f32 0.03125, %v1223_v32  ;;  %v1340_v31 = vrot.slane %v2423_v11, %v1339_v29 }
 0x881   : > { %v1228_v35 = vsub.f32 %v1217_v22, %v1226_v34  ;;  %v1229_v36 = vmul.f32 %v1227_v33, %v1227_v33 }
 0x883   : > { %v1231_v37 = vsel %vm628_vm2, %v1229_v36, 0.0  ;;  %v1230_v5 = vmul.f32 %v1228_v35, %v1228_v35 }
 0x884   : > { %1232 = vadd.xlane.f32.xlu0 %v1231_v37 }
 0x885   : > { %v1234_v39 = vsel %vm628_vm2, %v1230_v5, 0.0 }
 0x886   : > { %1235 = vadd.xlane.f32.xlu1 %v1234_v39 }
 0x911   : > { %v1233_v41 = vpop.xlane.xlu0 %1232 }
 0x912   : > { %v1237_v42 = vmul.f32 0.03125, %v1233_v41 }
 0x913   : > { %v1236_v43 = vpop.xlane.xlu1 %1235 }
 0x914   : > { %v1239_v44 = vadd.f32 1e-05, %v1237_v42  ;;  %v1238_v45 = vmul.f32 0.03125, %v1236_v43 }
 0x916   : > { %2109 = vrsqrt.f32 %v1239_v44  ;;  %v1240_v30 = vadd.f32 1e-05, %v1238_v45 }
 0x918   : > { %2111 = vrsqrt.f32 %v1240_v30 }
 0x920   : > { %v2110_v49 = vpop.eup %2109 }
 0x921   : > { %v1243_v38 = vmul.f32 %v2110_v49, %v1227_v33 }
 0x922   : > { %v2112_v50 = vpop.eup %2111 }
 0x923   : > { %v1249_v51 = vmul.f32 %v1248_v47, %v1243_v38  ;;  %v1244_v20 = vmul.f32 %v2112_v50, %v1228_v35 }
 0x925   : > { %v1250_v53 = vmul.f32 %v1248_v47, %v1244_v20  ;;  %v1255_v54 = vadd.f32 %v1254_v52, %v1249_v51 }
 0x927   : > { %v1256_v55 = vadd.f32 %v1254_v52, %v1250_v53 }
 0x929   : > { %v1257_v56 = vpack.c.bf16 %v1256_v55, %v1255_v54 }
 0x92b   : > { %1999 = vmatmul.mubr.msk.bf16.vlgmr.msra.gmra.mrb[20].mxu0 %vm628_vm2, %v1257_v56 }
 0x9fe   : > { %v1311_v62 = vpop.f32.mrb[20].mxu0 }
 0x9ff   : > { %v1312_v63 = vadd.f32 %v1311_v62, %v1261_v61  ;;  %v2000_v0 = vpop.f32.mrb[21].mxu0 }
 0xa00   : > { %v1314_v1 = vpop.f32.mrb[22].mxu0 }
 0xa01   : > { %v1320_v2 = vmul.f32 0.044715, %v1312_v63  ;;  %v1315_v4 = vadd.f32 %v1314_v1, %v1261_v61  ;;  %v2001_v7 = vpop.f32.mrb[23].mxu0  ;;  %v1318_v26 = vmul.f32 0.5, %v1312_v63  ;;  %v2242_v1 = vmov (!%p1865_p4), 0.0  }
 0xa02   : > { %2014 = vmatprep.subr.bf16.mxu0 (!%p1865_p4), %v2242_v1  ;;  %2024 = vmatprep.subr.bf16.mxu1 (!%p1865_p4), %v2242_v1 }
 0xa03   : > { %v1322_v8 = vmul.f32 %v1320_v2, %v1312_v63  ;;  %v1321_v10 = vmul.f32 0.044715, %v1315_v4  ;;  %v1319_v27 = vmul.f32 0.5, %v1315_v4  ;;  %2020 = vmatprep.mubr.msk.bf16.mxu0 (!%p1865_p4), %vm2243_vm7, %v2242_v1  ;;  %v2123_v2 = vld [vmem:[%s2649_s9 + $0x10] sm:$0xff] (!%p1865_p4)  }
 0xa05   : > { %v1324_v12 = vmul.f32 %v1322_v8, %v1312_v63  ;;  %v1323_v13 = vmul.f32 %v1321_v10, %v1315_v4  ;;  %v2124_v8 = vld [vmem:[%s2652_s12] sm:$0xff] (!%p1865_p4)  }
 0xa07   : > { %v1326_v14 = vadd.f32 %v1324_v12, %v1312_v63  ;;  %v1325_v15 = vmul.f32 %v1323_v13, %v1315_v4  ;;  %v1866_v12 = vld [vmem:[%s2650_s10] ss:$0 sm:$0xff] (!%p1865_p4) }
 0xa09   : > { %v1328_v18 = vmul.f32 0.7978846, %v1326_v14  ;;  %v1327_v3 = vadd.f32 %v1325_v15, %v1315_v4  ;;  %v1456_v4 = vld [vmem:[%s2647_s7] sm:$0x3] (!%p1865_p4) }
 0xa0a   : > { %v1457_v7 = vpack.c.bf16 (!%p1865_p4), %v1456_v4, %v1456_v4 }
 0xa0b   : > { %2113 = vtanh.f32 %v1328_v18  ;;  %v1329_v19 = vmul.f32 0.7978846, %v1327_v3 }
 0xa0d   : > { %2115 = vtanh.f32 %v1329_v19 }
 0xa15   : > { %v2114_v21 = vpop.eup %2113 }
 0xa16   : > { %v1332_v24 = vadd.f32 1.0, %v2114_v21  ;;  %v2125_v21 = vld [vmem:[%s2651_s11] sm:$0xff] (!%p1865_p4)  }
 0xa17   : > { %v2116_v25 = vpop.eup %2115 }
 0xa18   : > { %v1333_v28 = vadd.f32 1.0, %v2116_v25  ;;  %v1334_v16 = vmul.f32 %v1332_v24, %v1318_v26 }
 0xa1a   : > { %v1335_v22 = vmul.f32 %v1333_v28, %v1319_v27  ;;  %v2126_v28 = vld [vmem:[%s2651_s11 + $0x8] sm:$0xff] (!%p1865_p4)  }
 0xa1c   : > { %v1336_v23 = vpack.c.bf16 %v1335_v22, %v1334_v16 }
 0xa1e   : > { %2011 = vmatmul.mubr.msk.bf16.vlgmr.msra.gmra.mrb[20].mxu1 %vm1365_vm6, %v1336_v23 }
 0xa1f   : > { %2026 = vmatprep.mubr.msk.bf16.mxu1 (!%p1865_p4), %vm2243_vm7, %v2242_v1  ;;  %2025 = vmatpush3.bf16.msra.mxu1 (!%p1865_p4), %v2124_v8 }
 0xa20   : > { %2030 = vmatprep.subr.bf16.mxu1 (!%p1865_p4), %v2242_v1 }
 0xaf1   : > { %v1403_v32 = vpop.f32.mrb[20].mxu1 }
 0xaf2   : > { %v1404_v33 = vadd.f32 %v1403_v32, %v1340_v31  ;;  %v2012_v34 = vpop.f32.mrb[21].mxu1 }
 0xaf3   : > { %v1406_v35 = vpop.f32.mrb[22].mxu1  ;;  %v1876_v34 = vld [vmem:[%s2653_s13] ss:$0 sm:$0xff] (!%p1865_p4) }
 0xaf4   : > { %v1407_v36 = vadd.f32 %v1406_v35, %v1340_v31  ;;  %v2013_v37 = vpop.f32.mrb[23].mxu1  ;;  %v1410_v5 = vadd.f32 %v1404_v33, %v1255_v54  ;;  %v1440_v54 = vsub.s32 6, %v2420_v9 }
 0xaf6   : > { %v1412_v39 = vsel %vm628_vm2, %v1410_v5, 0.0  ;;  %v1411_v6 = vadd.f32 %v1407_v36, %v1256_v55  ;;  %v1446_v55 = vsub.s32 7, %v2420_v9  ;;  %v1441_v56 = vrot.slane %v2423_v11, %v1440_v54  ;;  %v2121_v9 = vld [vmem:[%s2649_s9] sm:$0xff] (!%p1865_p4)  }
 0xaf7   : > { %1413 = vadd.xlane.f32.xlu0 %v1412_v39  ;;  %2015 = vmatpush3.bf16.msra.mxu0 (!%p1865_p4), %v2121_v9 }
 0xaf8   : > { %v1415_v40 = vsel %vm628_vm2, %v1411_v6, 0.0  ;;  %v1447_v58 = vrot.slane %v2423_v11, %v1446_v55  ;;  %v2122_v11 = vld [vmem:[%s2649_s9 + $0x8] sm:$0xff] (!%p1865_p4)   ;;  %2016 = vmatprep.subr.bf16.mxu0 (!%p1865_p4), %v2242_v1 }
 0xaf9   : > { %1416 = vadd.xlane.f32.xlu1 %v1415_v40 }
 0xafb   : > { %2017 = vmatpush3.bf16.msra.mxu0 (!%p1865_p4), %v2122_v11 }
 0xafc   : > { %2018 = vmatprep.subr.bf16.mxu0 (!%p1865_p4), %v2242_v1 }
 0xaff   : > { %2019 = vmatpush3.bf16.msra.mxu0 (!%p1865_p4), %v2123_v2 }
 0xb02   : > { %2021 = vmatmul.mubr.msk.bf16.vlgmr.msra.gmra.mrb[0].mxu0 (!%p1865_p4), %vm1489_vm8, %v1457_v7 }
 0xb84   : > { %v1414_v41 = vpop.xlane.xlu0 %1413 }
 0xb85   : > { %v1418_v42 = vmul.f32 0.03125, %v1414_v41 }
 0xb86   : > { %v1417_v43 = vpop.xlane.xlu1 %1416 }
 0xb87   : > { %v1420_v44 = vsub.f32 %v1410_v5, %v1418_v42  ;;  %v1419_v45 = vmul.f32 0.03125, %v1417_v43 }
 0xb89   : > { %v1421_v30 = vsub.f32 %v1411_v6, %v1419_v45  ;;  %v1422_v46 = vmul.f32 %v1420_v44, %v1420_v44 }
 0xb8b   : > { %v1424_v47 = vsel %vm628_vm2, %v1422_v46, 0.0  ;;  %v1423_v48 = vmul.f32 %v1421_v30, %v1421_v30 }
 0xb8c   : > { %1425 = vadd.xlane.f32.xlu0 %v1424_v47  ;;  %v1675_v47 = vld [vmem:[%s2673_s22] sm:$0x3] (!%p1865_p4) }
 0xb8d   : > { %v1427_v49 = vsel %vm628_vm2, %v1423_v48, 0.0 }
 0xb8e   : > { %1428 = vadd.xlane.f32.xlu1 %v1427_v49 }
 0xbd5   : > { %v1527_v15 = vpop.f32.mrb[0].mxu0 (!%p1865_p4) }
 0xbd6   : > { %v1528_v18 = vadd.f32 (!%p1865_p4), %v1866_v12, %v1527_v15  ;;  %v2022_v3 = vpop.f32.mrb[1].mxu0 (!%p1865_p4) }
 0xbd7   : > { %v1530_v19 = vpop.f32.mrb[2].mxu0 (!%p1865_p4) }
 0xbd8   : > { %v1539_v26 = vpack.c.bf16 (!%p1865_p4), %v1528_v18, %v1528_v18  ;;  %v2023_v27 = vpop.f32.mrb[3].mxu0 (!%p1865_p4) }
 0xbda   : > { %2027 = vmatmul.mubr.msk.bf16.vlgmr.msra.gmra.mrb[0].mxu1 (!%p1865_p4), %vm681_vm3, %v1539_v26 }
 0xbdb   : > { %2031 = vmatpush3.bf16.msra.mxu1 (!%p1865_p4), %v2125_v21  ;;  %2034 = vmatprep.mubr.msk.bf16.mxu1 (!%p1865_p4), %vm2243_vm7, %v2242_v1 }
 0xbdc   : > { %2032 = vmatprep.subr.bf16.mxu1 (!%p1865_p4), %v2242_v1 }
 0xbdf   : > { %2033 = vmatpush3.bf16.msra.mxu1 (!%p1865_p4), %v2126_v28 }
 0xc19   : > { %v1426_v38 = vpop.xlane.xlu0 %1425 }
 0xc1a   : > { %v1430_v50 = vmul.f32 0.03125, %v1426_v38 }
 0xc1b   : > { %v1429_v51 = vpop.xlane.xlu1 %1428 }
 0xc1c   : > { %v1432_v20 = vadd.f32 1e-05, %v1430_v50  ;;  %v1431_v52 = vmul.f32 0.03125, %v1429_v51 }
 0xc1e   : > { %2117 = vrsqrt.f32 %v1432_v20  ;;  %v1433_v53 = vadd.f32 1e-05, %v1431_v52 }
 0xc20   : > { %2119 = vrsqrt.f32 %v1433_v53 }
 0xc28   : > { %v2118_v57 = vpop.eup %2117 }
 0xc29   : > { %v1436_v59 = vmul.f32 %v2118_v57, %v1420_v44 }
 0xc2a   : > { %v2120_v60 = vpop.eup %2119 }
 0xc2b   : > { %v1442_v17 = vmul.f32 %v1441_v56, %v1436_v59  ;;  %v1437_v61 = vmul.f32 %v2120_v60, %v1421_v30  ;;  %1455 = sbr.rel (%p1865_p4) target bundleno = 3825 (0xef1), region = 88 }
 0xc2d   : > { %v1448_v62 = vadd.f32 %v1447_v58, %v1442_v17  ;;  %v1443_v63 = vmul.f32 %v1441_v56, %v1437_v61 }
 0xc2f   : > { %1450 = vst.msk [vmem:[#allocation2] sm:$0xff] %vm628_vm2, %v1448_v62  ;;  %v1449_v0 = vadd.f32 %v1447_v58, %v1443_v63  ;;  %v1533_v13 = vpack.c.bf16 (!%p1865_p4), %v1448_v62, %v1448_v62 }
 0xc31   : > { %1451 = vst.msk [vmem:[#allocation2 + $0x8] sm:$0xff] %vm628_vm2, %v1449_v0  ;;  %v1534_v10 = vpack.c.bf16 (!%p1865_p4), %v1449_v0, %v1449_v0  ;;  %v1593_v24 = vunpack.c.l.b16 (!%p1865_p4), %v1533_v13 }
 0xc33   : > { %v1594_v14 = vunpack.c.l.b16 %v1534_v10 }
 0xc35   : > { %v1595_v25 = vrot.slane %v1594_v14, 7 }
 0xc37   : > { %v1597_v16 = vsel %vm1596_vm9, %v1595_v25, %v1593_v24 }
 0xc38   : > { %v1598_v22 = vpack.c.b16 %v1597_v16, %v1597_v16 }
 0xc3a   : > { %2035 = vmatmul.mubr.msk.bf16.vlgmr.msra.gmra.mrb[4].mxu1 %vm628_vm2, %v1598_v22 }
 0xcad   : > { %v1585_v23 = vpop.f32.mrb[0].mxu1 }
 0xcae   : > { %v2028_v29 = vpop.f32.mrb[1].mxu1 }
 0xcaf   : > { %v1588_v31 = vpop.f32.mrb[2].mxu1 }
 0xcb0   : > { %v2029_v32 = vpop.f32.mrb[3].mxu1 }
 0xd0d   : > { %v1648_v33 = vpop.f32.mrb[4].mxu1 }
 0xd0e   : > { %v1649_v35 = vadd.f32 %v1648_v33, %v1585_v23  ;;  %v2036_v36 = vpop.f32.mrb[5].mxu1 }
 0xd0f   : > { %v1651_v37 = vpop.f32.mrb[6].mxu1 }
 0xd10   : > { %v1661_v5 = vadd.f32 %v1876_v34, %v1649_v35  ;;  %v2037_v39 = vpop.f32.mrb[7].mxu1 }
 0xd12   : > { %v1664_v6 = vsel %vm1662_vm10, %v1661_v5, -inf  ;;  %1663 = vst.msk [vmem:[#allocation6] sm:$0x3] %vm1662_vm10, %v1661_v5 }
 0xd13   : > { %1665 = vmax.xlane.f32.xlu0 %v1664_v6 }
 0xda0   : > { %v1666_v40 = vpop.xlane.xlu0 %1665 }
 0xda1   : > { %v1667_v41 = vsub.f32 %v1661_v5, %v1666_v40 }
 0xda3   : > { %v1668_v42 = vmul.f32 1.442695, %v1667_v41 }
 0xda5   : > { %2127 = vpow2.f32 %v1668_v42 }
 0xdaf   : > { %v2128_v43 = vpop.eup %2127 }
 0xdb0   : > { %v1670_v44 = vsel %vm1662_vm10, %v2128_v43, 0.0 }
 0xdb1   : > { %1671 = vadd.xlane.f32.xlu0 %v1670_v44 }
 0xe3e   : > { %v1672_v45 = vpop.xlane.xlu0 %1671 }
 0xe3f   : > { %2129 = vlog2.f32 %v1672_v45 }
 0xe49   : > { %v2130_v30 = vpop.eup %2129 }
 0xe4a   : > { %v1674_v46 = vmul.f32 0.6931472, %v2130_v30 }
 0xe4c   : > { %v1676_v48 = vsub.f32 %v1667_v41, %v1674_v46 }
 0xe4e   : > { %v1677_v49 = vmul.f32 %v1676_v48, %v1675_v47 }
 0xe50   : > { %v1678_v38 = vsel %vm1662_vm10, %v1677_v49, 0.0 }
 0xe51   : > { %1679 = vadd.xlane.f32.xlu1 %v1678_v38 }
 0xede   : > { %v1680_v50 = vpop.xlane.xlu1 %1679 }
 0xedf   : > { %v1681_v51 = vsub.f32 0.0, %v1680_v50 }
 0xee1   : > { %v1683_v20 = vsel %vm1682_vm11, %v1681_v51, 0.0 }
 0xee2   : > { %v1684_v52 = vrot.slane %v1683_v20, 4 }
 0xee4   : > { %v1685_v53 = vadd.f32 %v1684_v52, %v1683_v20 }
 0xee6   : > { %v1686_v54 = vrot.slane %v1685_v53, 2 }
 0xee8   : > { %v1687_v55 = vadd.f32 %v1686_v54, %v1685_v53 }
 0xeea   : > { %v1688_v56 = vrot.slane %v1687_v55, 1 }
 0xeec   : > { %v1689_v57 = vadd.f32 %v1688_v56, %v1687_v55 }
 0xeee   : > { %v1690_v58 = vmul.f32 0.5, %v1689_v57 }
 0xef0   : > { %1692 = vst.msk [vmem:[#allocation7] sm:$0x1] %vm1691_vm12, %v1690_v58 }
 0xef1 PF: > { %p2056_p6 = scmp.eq.s32.totalorder %s2332_s19, 1  ;;  %s2244_s17 = smov [#allocation6]  }
 0xef2   : > { %s1700_s20 = sshll.u32 %s2244_s17, 4  ;;  %s2245_s24 = smov [#allocation7]   ;;  %s1701_s20 = int_to_ptr.vmem [resolvable:$true] %s1700_s20 }
 0xef3   : > { %s1711_s25 = sshll.u32 %s2245_s24, 4  ;;  %s2159_s23 = scalar_lea.vmem %s1701_s20, 32  ;;  %s1712_s25 = int_to_ptr.vmem [resolvable:$true] %s1711_s25 }
 0xef4   : > { %p2160_p10 = scmp.ne.s32.totalorder %s1701_s20, %s2159_s23  ;;  %p2166_p13 = scmp.lt.s32.totalorder %s1701_s20, %s1701_s20 }
 0xef5   : > { %p2167_p0 = scmp.lt.s32.totalorder %s2159_s23, %s2159_s23 }
 0xef6   : > { %p2161_p11 = pnand %p2160_p10, %p2056_p6 }
 0xef7   : > { %p2168_p1 = por %p2167_p0, %p2166_p13 }
 0xef8   : > { %p2162_p12 = pneg %p2161_p11 }
 0xefa   : > { %p2169_p5 = pnand %p2168_p1, %p2162_p12 }
 0xefc   : > { %2172 = shalt.err (!%p2169_p5)
}
 0xefd   : > { %s2674_s27 = sld [smem:[#allocation15_spill]] }
 0xf03   : > { %s2173_s16 = scalar_lea.hbm %s2674_s27, 32 }
 0xf04   : > { %p2174_p7 = scmp.ne.s32.totalorder %s2674_s27, %s2173_s16  ;;  %p2179_p2 = scmp.lt.u32.totalorder %s2173_s16, %s2674_s27 }
 0xf06   : > { %p2175_p9 = pnand %p2174_p7, %p2056_p6 }
 0xf08   : > { %p2176_p8 = pneg %p2175_p9 }
 0xf0a   : > { %p2181_p3 = pnand %p2179_p2, %p2176_p8 }
 0xf0c   : > { %2184 = shalt.err (!%p2181_p3)
}
 0xf0d   : > { %2043 = dma.vmem_to_hbm [thread:$0]  (%p2056_p6), %s1701_s20, 32, %s2674_s27, [#allocation5]  }
 0xf0e   : > { %s2185_s18 = scalar_lea.vmem %s1712_s25, 16  ;;  %s2191_s30 = scalar_lea.vmem %s1712_s25, 32 }
 0xf0f   : > { %p2186_p4 = scmp.ne.s32.totalorder %s1712_s25, %s2185_s18  ;;  %p2192_p12 = scmp.lt.s32.totalorder %s1712_s25, %s1712_s25 }
 0xf10   : > { %p2193_p13 = scmp.lt.s32.totalorder %s2191_s30, %s2185_s18 }
 0xf11   : > { %p2187_p10 = pnand %p2186_p4, %p2056_p6 }
 0xf12   : > { %p2194_p0 = por %p2193_p13, %p2192_p12 }
 0xf13   : > { %p2188_p11 = pneg %p2187_p10 }
 0xf15   : > { %p2195_p1 = pnand %p2194_p0, %p2188_p11 }
 0xf17   : > { %2198 = shalt.err (!%p2195_p1)
}
 0xf18   : > { %s2675_s24 = sld [smem:[#allocation16_spill]] }
 0xf1e   : > { %s2199_s23 = scalar_lea.hbm %s2675_s24, 16 }
 0xf1f   : > { %p2200_p5 = scmp.ne.s32.totalorder %s2675_s24, %s2199_s23  ;;  %p2205_p8 = scmp.lt.u32.totalorder %s2199_s23, %s2675_s24 }
 0xf21   : > { %p2201_p7 = pnand %p2200_p5, %p2056_p6 }
 0xf23   : > { %p2202_p9 = pneg %p2201_p7 }
 0xf25   : > { %p2207_p2 = pnand %p2205_p8, %p2202_p9 }
 0xf27   : > { %2210 = shalt.err (!%p2207_p2)
}
 0xf28   : > { %2045 = dma.vmem_to_hbm [thread:$0]  (%p2056_p6), %s1712_s25, 16, %s2675_s24, [#allocation8]  }
 0xf29   : > { %2220 = dma.done.wait (%p2056_p6), [#allocation5], 32  }
 0xf2a   : > { %2222 = vsyncadd (%p2056_p6), [#allocation5], 4294967264 }
 0xf2b   : > { %2224 = dma.done.wait (%p2056_p6), [#allocation8], 16  }
 0xf2c   : > { %2226 = vsyncadd (%p2056_p6), [#allocation8], 4294967280 }
 0xf2d PF: > { %s2676_s14 = sld [smem:[#allocation12_spill]] }
 0xf33   : > { %s29_s18 = sadd.s32 1, %s2676_s14  }
 0xf34   : > { %p26_p3 = scmp.ge.s32.totalorder %s29_s18, 4  }
 0xf36   :  { %28 = sbr.rel (!%p26_p3) target bundleno = 8 (0x8), region = 136 }
 0xf3d   :  { %1728 = vsyncpa [#allocation4], 1 }
 0xf3e   :  { %1730 = vsyncpa [#allocation4 + $0x1], 1 }
 0xf3f   :  { %1731 = vsyncpa [#allocation5], 1 }
 0xf40   :  { %1733 = vsyncpa [#allocation5 + $0x1], 1 }
 0xf41   :  { %1734 = vsyncpa [#allocation8], 1 }

</bundles_post_ra>
